<compile_context>
chip_gen: v6e
topology: v6e:2x2x1
jax: 0.10.0
libtpu: 0.0.40
codegen_flags: <defaults>
</compile_context>

<pallas_src>
import functools

import jax
import jax.numpy as jnp
from jax import lax
from jax.experimental import pallas as pl
from jax.experimental.pallas import tpu as pltpu

TEMPERATURE = 0.01


# ----------------------------- Pallas kernel --------------------------------
def _fused_grouped_conv_kernel(w_ref, x_ref, o_ref, acc_ref, *, offsets, q_out):
    """One (batch image, C_in-tile) grid step of the grouped ensemble conv.

    w_ref  : (k*k, N, C_out, TC)  compute dtype   (weights for this C_in tile)
    x_ref  : (N, TC, Q_in)        compute dtype   (flattened padded image, one b)
    o_ref  : (N, C_out, Q_out)    x.dtype         (flat output, lane axis = Ho*Wp)
    acc_ref: (N, C_out, Q_out)    f32             (accumulator across C_in tiles)
    """
    c = pl.program_id(1)

    @pl.when(c == 0)
    def _():
        acc_ref[...] = jnp.zeros_like(acc_ref)

    # k*k shifted-slice matmuls: the im2col "patches" are never materialized --
    # each kernel tap (kh, kw) is a static lane-offset slice of the flat image.
    contrib = None
    for i, off in enumerate(offsets):
        w_i = w_ref[i]                                  # (N, C_out, TC)
        x_i = x_ref[:, :, off:off + q_out]              # (N, TC, Q_out)
        t = jnp.einsum("nok,nkm->nom", w_i, x_i,
                       preferred_element_type=jnp.float32)
        contrib = t if contrib is None else contrib + t

    acc_ref[...] += contrib
    o_ref[...] = acc_ref[...].astype(o_ref.dtype)


def _pick_cin_tile(c_in, n_members, q_in, itemsize, budget_bytes=8 << 20):
    """C_in reduction-tile size.  Must be full C_in or a 128-multiple divisor
    (the weight block's lane dim is the C_in tile)."""
    if n_members * c_in * q_in * itemsize <= budget_bytes or c_in % 128 != 0:
        return c_in
    tc = c_in
    while tc % 256 == 0 and n_members * tc * q_in * itemsize > budget_bytes:
        tc //= 2
    return tc


def fused_baens_conv(xg, w, *, kernel_size, padding, dilation,
                     compute_dtype=jnp.bfloat16):
    """Grouped (groups = N) batch-ensemble conv, stride 1, im2col fused in-kernel.

    xg : (B, N, C_in, H, W)
    w  : (N, C_out, C_in, k, k)  float32 quantized weights
    returns (B, N, C_out, Ho, Wo) in xg.dtype
    """
    B, N, C_in, H, W = xg.shape
    _, C_out, _, k, _ = w.shape
    pad, dil = padding, dilation

    Hp, Wp = H + 2 * pad, W + 2 * pad
    Ho = Hp - dil * (k - 1)
    Wo = Wp - dil * (k - 1)
    # tail rows so the shifted slices of the flattened image never run OOB
    extra_rows = -(-((k - 1) * dil) // Wp) if k > 1 else 0
    q_in = (Hp + extra_rows) * Wp
    q_out = Ho * Wp                      # junk columns at x >= Wo, sliced off later

    # Cast BEFORE padding/flattening: the only materialized intermediate is a
    # compute-dtype copy of the (non-expanded) input.
    xc = xg.astype(compute_dtype)
    xp = jnp.pad(xc, ((0, 0), (0, 0), (0, 0),
                      (pad, pad + extra_rows), (pad, pad)))
    xflat = xp.reshape(B, N, C_in, q_in)

    # Weights in (k*k, N, C_out, C_in) layout so w_ref[i] is one tap's matrix.
    w_kern = jnp.transpose(w.reshape(N, C_out, C_in, k * k),
                           (3, 0, 1, 2)).astype(compute_dtype)

    offsets = tuple(kh * dil * Wp + kw * dil
                    for kh in range(k) for kw in range(k))

    itemsize_c = jnp.dtype(compute_dtype).itemsize
    out_dtype = xg.dtype
    itemsize_o = jnp.dtype(out_dtype).itemsize

    # TODO(synk): very large C_in x Hp*Wp (image + channels both huge) would
    # additionally need Q tiling with halo DMA; out of scope here.
    tc = _pick_cin_tile(C_in, N, q_in, itemsize_c)
    n_ct = C_in // tc

    # vmem limit sized to the actual tile footprint (double-buffered in/out +
    # f32 accumulator), capped at 64 MiB so it is safe on v7x.
    vmem_bytes = (2 * N * tc * q_in * itemsize_c
                  + 2 * (k * k) * N * C_out * tc * itemsize_c
                  + 2 * N * C_out * q_out * itemsize_o
                  + N * C_out * q_out * 4)
    vmem_limit = int(min(64 << 20, max(32 << 20, 2 * vmem_bytes + (2 << 20))))

    kernel = functools.partial(_fused_grouped_conv_kernel,
                               offsets=offsets, q_out=q_out)

    out_flat = pl.pallas_call(
        kernel,
        out_shape=jax.ShapeDtypeStruct((B, N, C_out, q_out), out_dtype),
        grid_spec=pltpu.PrefetchScalarGridSpec(
            num_scalar_prefetch=0,
            grid=(B, n_ct),
            in_specs=[
                # Weights: tiny, tiled only on the C_in reduction axis.
                pl.BlockSpec((k * k, N, C_out, tc), lambda b, c: (0, 0, 0, c)),
                # Input: one batch element's flattened padded image, C_in tile.
                pl.BlockSpec((None, N, tc, q_in), lambda b, c: (b, 0, c, 0)),
            ],
            out_specs=pl.BlockSpec((None, N, C_out, q_out),
                                   lambda b, c: (b, 0, 0, 0)),
            scratch_shapes=[pltpu.VMEM((N, C_out, q_out), jnp.float32)],
        ),
        compiler_params=pltpu.CompilerParams(
            dimension_semantics=("parallel", "arbitrary"),
            vmem_limit_bytes=vmem_limit),
    )(w_kern, xflat)

    # Drop the junk columns (x >= Wo).  No transpose needed: (B, N, C_out, ...)
    # already matches the reference (B*N, C_out, ...) layout after a reshape.
    out = out_flat.reshape(B, N, C_out, Ho, Wp)[..., :Wo]
    return out


# ----------------------- residual bit-tree quantization ---------------------
def _df_lt(a, b, temp):
    return jax.nn.sigmoid((a - b) / temp)


def compute_quantized_weight(U, thres_mean, res_denos, max_bw_pow):
    """Residual-bit-tree quantization of U (N, D) -> summed quantized values."""
    N, D = U.shape
    beta = jnp.max(U)
    alpha = jnp.min(U)
    denos = res_denos[:max_bw_pow].astype(jnp.float32)

    # first level: plain uniform quantization (self.round == floor in forward)
    s = (beta - alpha) / denos[0]
    vals_sum = s * jnp.floor(U / s)

    for idx in range(1, max_bw_pow):
        s = s / denos[idx]
        res_err = U - vals_sum                                     # (N, D)
        order = jnp.argsort(res_err, axis=0)                       # torch.sort indices
        sorted_err = jnp.take_along_axis(res_err, order, axis=0)   # (N, D)

        delta = sorted_err[1:] - sorted_err[:-1]                   # (N-1, D)
        dmax = jnp.maximum(jnp.max(delta), 1e-12)                  # NaN guard (0/0)
        delta = delta / dmax
        split_point = _df_lt(delta.mean(axis=1),
                             jax.nn.sigmoid(thres_mean), 0.01)     # (N-1,)
        split_round = jnp.round(split_point)                       # 0./1.
        # TODO(synk): self.npartitions host-side (.item()) bookkeeping not replicated.

        # segment id of each sorted row = number of closing splits before it
        seg_id = jnp.concatenate(
            [jnp.zeros((1,), jnp.int32),
             jnp.cumsum(split_round.astype(jnp.int32))])           # (N,)
        S = jax.nn.one_hot(seg_id, N, dtype=jnp.float32)           # (rows N, groups N)

        group_sum = S.T @ sorted_err                               # (N, D)
        group_cnt = jnp.sum(S, axis=0)                             # (N,)
        group_mean = group_sum / jnp.maximum(group_cnt, 1.0)[:, None]

        # grad_ accumulated in the reference python loop:
        #   non-split rows contribute (1 - split_point), the closing split row
        #   contributes split_point, the very last row contributes nothing.
        f = jnp.where(split_round > 0.5, split_point, 1.0 - split_point)  # (N-1,)
        f_pad = jnp.concatenate([f, jnp.ones((1,), jnp.float32)])         # (N,)
        masked = S * f_pad[:, None] + (1.0 - S)                           # (N, N)
        group_grad = jnp.prod(masked, axis=0)                             # (N,)

        # value assigned to every sorted row of its group
        t = S @ (group_grad[:, None] * group_mean)                 # (N, D)

        # scatter back from sorted order: grouped[order[c, b], b] = t[c, b]
        T = jax.nn.one_hot(order, N, dtype=jnp.float32)            # (c, b, a)
        grouped = jnp.einsum('cb,cba->ab', t, T)                   # (N, D)

        vals_sum = vals_sum + s * jnp.floor(grouped / s)

    return vals_sum


# --------------------------------- forward ----------------------------------
def conv2d_res_bit_tree_forward(x, U, thres_mean, res_denos, *,
                                N, in_channels, out_channels, kernel_size,
                                stride=1, padding=0, dilation=1,
                                bw=2, first=False,
                                compute_dtype=jnp.bfloat16):
    k = kernel_size

    # ---- residual-bit-tree quantized weights ----
    vals_sum = compute_quantized_weight(U, thres_mean, res_denos, bw)   # (N, D)
    # torch: vals.sum(0).view(out_channels*N, in_channels, k, k) -> per member
    w = vals_sum.reshape(N, out_channels, in_channels, k, k)

    # ---- input reshape (grouped / batch-ensemble layout) ----
    if not first:
        BN, C, H, W = x.shape
        B = BN // N
        xg = x.reshape(B, N, C, H, W)      # == torch .view(B, N*C, H, W), groups = N
    else:
        B, NC, H, W = x.shape
        xg = x.reshape(B, N, NC // N, H, W)

    if stride == 1:
        # NOTE: compute_dtype=bf16 quantizes the (s * integer) weight levels to
        # bf16 before the MXU (f32 accumulation); pass jnp.float32 for closer
        # parity with the f32 PyTorch reference.
        out = fused_baens_conv(xg, w, kernel_size=k, padding=padding,
                               dilation=dilation,
                               compute_dtype=compute_dtype)  # (B,N,C_out,Ho,Wo)
    else:
        # TODO(synk): strided convs fall back to XLA's grouped conv (no Pallas path).
        w_full = w.reshape(N * out_channels, in_channels, k, k)
        out4 = lax.conv_general_dilated(
            xg.reshape(B, N * xg.shape[2], H, W), w_full,
            window_strides=(stride, stride),
            padding=[(padding, padding)] * 2,
            rhs_dilation=(dilation, dilation),
            dimension_numbers=("NCHW", "OIHW", "NCHW"),
            feature_group_count=N)
        out = out4.reshape(B, N, out_channels, out4.shape[2], out4.shape[3])

    Ho, Wo = out.shape[3], out.shape[4]
    act = out.reshape(B * N, out_channels, Ho, Wo)
    # TODO(synk): reference prints & exits on NaN; caller asserts on finiteness instead.
    return act.astype(x.dtype)


if __name__ == "__main__":
    # Small shapes consistent with the module (batch=2 per member, N=4 members,
    # channels 4 -> 8, 3x3 conv, 16x16 spatial, bw=3).
    N, in_channels, out_channels, ksz, bw = 4, 4, 8, 3, 3
    stride, padding, dilation = 1, 1, 1
    B, H, W = 2, 16, 16
    D = in_channels * out_channels * ksz * ksz          # 288

    key = jax.random.PRNGKey(0)
    k_u, k_x = jax.random.split(key)

    # kaiming_normal_(U): fan_in = D, gain = sqrt(2)
    U = jax.random.normal(k_u, (N, D), jnp.float32) * jnp.sqrt(2.0 / D)
    thres_mean = jnp.array([-0.405], jnp.float32)
    thres_var = jnp.array([-2.197], jnp.float32)   # unused in forward (kept for parity)
    res_denos = jnp.array([2 ** 2 - 1, 2 ** 2 + 1, 2 ** 4 + 1,
                           2 ** 8 + 1, 2 ** 16 + 1], jnp.float32)

    x = jax.random.normal(k_x, (B * N, in_channels, H, W), jnp.float32)

    act = conv2d_res_bit_tree_forward(
        x, U, thres_mean, res_denos,
        N=N, in_channels=in_channels, out_channels=out_channels,
        kernel_size=ksz, stride=stride, padding=padding, dilation=dilation,
        bw=bw, first=False)
    act = jax.block_until_ready(act)

    Ho = (H + 2 * padding - dilation * (ksz - 1) - 1) // stride + 1
    assert act.shape == (B * N, out_channels, Ho, Ho), act.shape
    assert not bool(jnp.any(jnp.isnan(act)))

    # Cross-check the fused Pallas conv against XLA's grouped conv with the
    # same quantized f32 weights (loose tolerance: bf16 compute path).
    vals_sum = compute_quantized_weight(U, thres_mean, res_denos, bw)
    w_full = vals_sum.reshape(N * out_channels, in_channels, ksz, ksz)
    ref = lax.conv_general_dilated(
        x.reshape(B, N * in_channels, H, W), w_full,
        window_strides=(stride, stride),
        padding=[(padding, padding)] * 2,
        rhs_dilation=(dilation, dilation),
        dimension_numbers=("NCHW", "OIHW", "NCHW"),
        feature_group_count=N)
    ref = ref.reshape(B * N, out_channels, Ho, Ho)
    tol = 5e-2 * float(jnp.max(jnp.abs(ref)) + 1.0)
    err = float(jnp.max(jnp.abs(act.astype(jnp.float32) - ref)))
    assert err < tol, (err, tol)

    print("KERNEL_OK")
</pallas_src>

<mosaic_0001>
module attributes {stable_mosaic.version = 11 : i64} {
  func.func @_fused_grouped_conv_kernel(%arg0: i32, %arg1: i32, %arg2: memref<9x4x8x4xbf16, #tpu.memory_space<vmem>>, %arg3: memref<1x4x4x342xbf16, #tpu.memory_space<vmem>>, %arg4: memref<1x4x8x288xf32, #tpu.memory_space<vmem>>, %arg5: memref<4x8x288xf32, #tpu.memory_space<vmem>>) attributes {dimension_semantics = [#tpu.dimension_semantics<parallel>, #tpu.dimension_semantics<arbitrary>], iteration_bounds = array<i64: 2, 1>, scalar_prefetch = 0 : i64, scratch_operands = 1 : i64, tpu.core_type = #tpu.core_type<tc>, window_params = [{transform_indices = @transform_0, window_bounds = array<i64: 9, 4, 8, 4>}, {transform_indices = @transform_1, window_bounds = array<i64: 1, 4, 4, 342>}, {transform_indices = @transform_2, window_bounds = array<i64: 1, 4, 8, 288>}]} {
    %c0_i32 = arith.constant 0 : i32
    %0 = arith.cmpi eq, %arg1, %c0_i32 : i32
    %1 = arith.extui %0 : i1 to i32
    %c0_i32_0 = arith.constant 0 : i32
    %2 = arith.cmpi ne, %1, %c0_i32_0 : i32
    scf.if %2 {
      %cst_79 = arith.constant 0.000000e+00 : f32
      %63 = vector.broadcast %cst_79 : f32 to vector<4x8x288xf32>
      %c0_80 = arith.constant 0 : index
      %c0_81 = arith.constant 0 : index
      %c0_82 = arith.constant 0 : index
      %64 = vector.load %arg5[%c0_80, %c0_81, %c0_82] : memref<4x8x288xf32, #tpu.memory_space<vmem>>, vector<4x8x288xf32>
      tpu.vector_store %arg5[%c0_80, %c0_81, %c0_82], %63 {strides = array<i32>} : memref<4x8x288xf32, #tpu.memory_space<vmem>>, vector<4x8x288xf32>,
    } else {
    }
    %c0 = arith.constant 0 : index
    %c0_1 = arith.constant 0 : index
    %c0_2 = arith.constant 0 : index
    %c0_3 = arith.constant 0 : index
    %3 = vector.load %arg2[%c0, %c0_1, %c0_2, %c0_3] : memref<9x4x8x4xbf16, #tpu.memory_space<vmem>>, vector<1x4x8x4xbf16>
    %4 = vector.shape_cast %3 : vector<1x4x8x4xbf16> to vector<4x8x4xbf16>
    %c0_4 = arith.constant 0 : index
    %c0_5 = arith.constant 0 : index
    %c0_6 = arith.constant 0 : index
    %c0_7 = arith.constant 0 : index
    %5 = vector.load %arg3[%c0_4, %c0_5, %c0_6, %c0_7] : memref<1x4x4x342xbf16, #tpu.memory_space<vmem>>, vector<1x4x4x288xbf16>
    %6 = vector.shape_cast %5 : vector<1x4x4x288xbf16> to vector<4x4x288xbf16>
    "tpu.trace_start"() <{level = 10 : i32, message = "nok,nkm->nom"}> : () -> ()
    %cst = arith.constant dense<0.000000e+00> : vector<4x8x288xf32>
    %7 = tpu.matmul %4, %6, %cst {dimension_numbers = #tpu.dot_dimension_numbers<[2], [1], [1], [2], [0, 0, 0, 1, 1, 2], [0], [0]>} : vector<4x8x4xbf16>, vector<4x4x288xbf16>, vector<4x8x288xf32> -> vector<4x8x288xf32>
    "tpu.trace_stop"() : () -> ()
    %c1 = arith.constant 1 : index
    %c0_8 = arith.constant 0 : index
    %c0_9 = arith.constant 0 : index
    %c0_10 = arith.constant 0 : index
    %8 = vector.load %arg2[%c1, %c0_8, %c0_9, %c0_10] : memref<9x4x8x4xbf16, #tpu.memory_space<vmem>>, vector<1x4x8x4xbf16>
    %9 = vector.shape_cast %8 : vector<1x4x8x4xbf16> to vector<4x8x4xbf16>
    %c0_11 = arith.constant 0 : index
    %c0_12 = arith.constant 0 : index
    %c0_13 = arith.constant 0 : index
    %c1_14 = arith.constant 1 : index
    %10 = vector.load %arg3[%c0_11, %c0_12, %c0_13, %c1_14] : memref<1x4x4x342xbf16, #tpu.memory_space<vmem>>, vector<1x4x4x288xbf16>
    %11 = vector.shape_cast %10 : vector<1x4x4x288xbf16> to vector<4x4x288xbf16>
    "tpu.trace_start"() <{level = 10 : i32, message = "nok,nkm->nom"}> : () -> ()
    %cst_15 = arith.constant dense<0.000000e+00> : vector<4x8x288xf32>
    %12 = tpu.matmul %9, %11, %cst_15 {dimension_numbers = #tpu.dot_dimension_numbers<[2], [1], [1], [2], [0, 0, 0, 1, 1, 2], [0], [0]>} : vector<4x8x4xbf16>, vector<4x4x288xbf16>, vector<4x8x288xf32> -> vector<4x8x288xf32>
    "tpu.trace_stop"() : () -> ()
    %13 = arith.addf %7, %12 : vector<4x8x288xf32>
    %c2 = arith.constant 2 : index
    %c0_16 = arith.constant 0 : index
    %c0_17 = arith.constant 0 : index
    %c0_18 = arith.constant 0 : index
    %14 = vector.load %arg2[%c2, %c0_16, %c0_17, %c0_18] : memref<9x4x8x4xbf16, #tpu.memory_space<vmem>>, vector<1x4x8x4xbf16>
    %15 = vector.shape_cast %14 : vector<1x4x8x4xbf16> to vector<4x8x4xbf16>
    %c0_19 = arith.constant 0 : index
    %c0_20 = arith.constant 0 : index
    %c0_21 = arith.constant 0 : index
    %c2_22 = arith.constant 2 : index
    %16 = vector.load %arg3[%c0_19, %c0_20, %c0_21, %c2_22] : memref<1x4x4x342xbf16, #tpu.memory_space<vmem>>, vector<1x4x4x288xbf16>
    %17 = vector.shape_cast %16 : vector<1x4x4x288xbf16> to vector<4x4x288xbf16>
    "tpu.trace_start"() <{level = 10 : i32, message = "nok,nkm->nom"}> : () -> ()
    %cst_23 = arith.constant dense<0.000000e+00> : vector<4x8x288xf32>
    %18 = tpu.matmul %15, %17, %cst_23 {dimension_numbers = #tpu.dot_dimension_numbers<[2], [1], [1], [2], [0, 0, 0, 1, 1, 2], [0], [0]>} : vector<4x8x4xbf16>, vector<4x4x288xbf16>, vector<4x8x288xf32> -> vector<4x8x288xf32>
    "tpu.trace_stop"() : () -> ()
    %19 = arith.addf %13, %18 : vector<4x8x288xf32>
    %c3 = arith.constant 3 : index
    %c0_24 = arith.constant 0 : index
    %c0_25 = arith.constant 0 : index
    %c0_26 = arith.constant 0 : index
    %20 = vector.load %arg2[%c3, %c0_24, %c0_25, %c0_26] : memref<9x4x8x4xbf16, #tpu.memory_space<vmem>>, vector<1x4x8x4xbf16>
    %21 = vector.shape_cast %20 : vector<1x4x8x4xbf16> to vector<4x8x4xbf16>
    %c0_27 = arith.constant 0 : index
    %c0_28 = arith.constant 0 : index
    %c0_29 = arith.constant 0 : index
    %c18 = arith.constant 18 : index
    %22 = vector.load %arg3[%c0_27, %c0_28, %c0_29, %c18] : memref<1x4x4x342xbf16, #tpu.memory_space<vmem>>, vector<1x4x4x288xbf16>
    %23 = vector.shape_cast %22 : vector<1x4x4x288xbf16> to vector<4x4x288xbf16>
    "tpu.trace_start"() <{level = 10 : i32, message = "nok,nkm->nom"}> : () -> ()
    %cst_30 = arith.constant dense<0.000000e+00> : vector<4x8x288xf32>
    %24 = tpu.matmul %21, %23, %cst_30 {dimension_numbers = #tpu.dot_dimension_numbers<[2], [1], [1], [2], [0, 0, 0, 1, 1, 2], [0], [0]>} : vector<4x8x4xbf16>, vector<4x4x288xbf16>, vector<4x8x288xf32> -> vector<4x8x288xf32>
    "tpu.trace_stop"() : () -> ()
    %25 = arith.addf %19, %24 : vector<4x8x288xf32>
    %c4 = arith.constant 4 : index
    %c0_31 = arith.constant 0 : index
    %c0_32 = arith.constant 0 : index
    %c0_33 = arith.constant 0 : index
    %26 = vector.load %arg2[%c4, %c0_31, %c0_32, %c0_33] : memref<9x4x8x4xbf16, #tpu.memory_space<vmem>>, vector<1x4x8x4xbf16>
    %27 = vector.shape_cast %26 : vector<1x4x8x4xbf16> to vector<4x8x4xbf16>
    %c0_34 = arith.constant 0 : index
    %c0_35 = arith.constant 0 : index
    %c0_36 = arith.constant 0 : index
    %c19 = arith.constant 19 : index
    %28 = vector.load %arg3[%c0_34, %c0_35, %c0_36, %c19] : memref<1x4x4x342xbf16, #tpu.memory_space<vmem>>, vector<1x4x4x288xbf16>
    %29 = vector.shape_cast %28 : vector<1x4x4x288xbf16> to vector<4x4x288xbf16>
    "tpu.trace_start"() <{level = 10 : i32, message = "nok,nkm->nom"}> : () -> ()
    %cst_37 = arith.constant dense<0.000000e+00> : vector<4x8x288xf32>
    %30 = tpu.matmul %27, %29, %cst_37 {dimension_numbers = #tpu.dot_dimension_numbers<[2], [1], [1], [2], [0, 0, 0, 1, 1, 2], [0], [0]>} : vector<4x8x4xbf16>, vector<4x4x288xbf16>, vector<4x8x288xf32> -> vector<4x8x288xf32>
    "tpu.trace_stop"() : () -> ()
    %31 = arith.addf %25, %30 : vector<4x8x288xf32>
    %c5 = arith.constant 5 : index
    %c0_38 = arith.constant 0 : index
    %c0_39 = arith.constant 0 : index
    %c0_40 = arith.constant 0 : index
    %32 = vector.load %arg2[%c5, %c0_38, %c0_39, %c0_40] : memref<9x4x8x4xbf16, #tpu.memory_space<vmem>>, vector<1x4x8x4xbf16>
    %33 = vector.shape_cast %32 : vector<1x4x8x4xbf16> to vector<4x8x4xbf16>
    %c0_41 = arith.constant 0 : index
    %c0_42 = arith.constant 0 : index
    %c0_43 = arith.constant 0 : index
    %c20 = arith.constant 20 : index
    %34 = vector.load %arg3[%c0_41, %c0_42, %c0_43, %c20] : memref<1x4x4x342xbf16, #tpu.memory_space<vmem>>, vector<1x4x4x288xbf16>
    %35 = vector.shape_cast %34 : vector<1x4x4x288xbf16> to vector<4x4x288xbf16>
    "tpu.trace_start"() <{level = 10 : i32, message = "nok,nkm->nom"}> : () -> ()
    %cst_44 = arith.constant dense<0.000000e+00> : vector<4x8x288xf32>
    %36 = tpu.matmul %33, %35, %cst_44 {dimension_numbers = #tpu.dot_dimension_numbers<[2], [1], [1], [2], [0, 0, 0, 1, 1, 2], [0], [0]>} : vector<4x8x4xbf16>, vector<4x4x288xbf16>, vector<4x8x288xf32> -> vector<4x8x288xf32>
    "tpu.trace_stop"() : () -> ()
    %37 = arith.addf %31, %36 : vector<4x8x288xf32>
    %c6 = arith.constant 6 : index
    %c0_45 = arith.constant 0 : index
    %c0_46 = arith.constant 0 : index
    %c0_47 = arith.constant 0 : index
    %38 = vector.load %arg2[%c6, %c0_45, %c0_46, %c0_47] : memref<9x4x8x4xbf16, #tpu.memory_space<vmem>>, vector<1x4x8x4xbf16>
    %39 = vector.shape_cast %38 : vector<1x4x8x4xbf16> to vector<4x8x4xbf16>
    %c0_48 = arith.constant 0 : index
    %c0_49 = arith.constant 0 : index
    %c0_50 = arith.constant 0 : index
    %c36 = arith.constant 36 : index
    %40 = vector.load %arg3[%c0_48, %c0_49, %c0_50, %c36] : memref<1x4x4x342xbf16, #tpu.memory_space<vmem>>, vector<1x4x4x288xbf16>
    %41 = vector.shape_cast %40 : vector<1x4x4x288xbf16> to vector<4x4x288xbf16>
    "tpu.trace_start"() <{level = 10 : i32, message = "nok,nkm->nom"}> : () -> ()
    %cst_51 = arith.constant dense<0.000000e+00> : vector<4x8x288xf32>
    %42 = tpu.matmul %39, %41, %cst_51 {dimension_numbers = #tpu.dot_dimension_numbers<[2], [1], [1], [2], [0, 0, 0, 1, 1, 2], [0], [0]>} : vector<4x8x4xbf16>, vector<4x4x288xbf16>, vector<4x8x288xf32> -> vector<4x8x288xf32>
    "tpu.trace_stop"() : () -> ()
    %43 = arith.addf %37, %42 : vector<4x8x288xf32>
    %c7 = arith.constant 7 : index
    %c0_52 = arith.constant 0 : index
    %c0_53 = arith.constant 0 : index
    %c0_54 = arith.constant 0 : index
    %44 = vector.load %arg2[%c7, %c0_52, %c0_53, %c0_54] : memref<9x4x8x4xbf16, #tpu.memory_space<vmem>>, vector<1x4x8x4xbf16>
    %45 = vector.shape_cast %44 : vector<1x4x8x4xbf16> to vector<4x8x4xbf16>
    %c0_55 = arith.constant 0 : index
    %c0_56 = arith.constant 0 : index
    %c0_57 = arith.constant 0 : index
    %c37 = arith.constant 37 : index
    %46 = vector.load %arg3[%c0_55, %c0_56, %c0_57, %c37] : memref<1x4x4x342xbf16, #tpu.memory_space<vmem>>, vector<1x4x4x288xbf16>
    %47 = vector.shape_cast %46 : vector<1x4x4x288xbf16> to vector<4x4x288xbf16>
    "tpu.trace_start"() <{level = 10 : i32, message = "nok,nkm->nom"}> : () -> ()
    %cst_58 = arith.constant dense<0.000000e+00> : vector<4x8x288xf32>
    %48 = tpu.matmul %45, %47, %cst_58 {dimension_numbers = #tpu.dot_dimension_numbers<[2], [1], [1], [2], [0, 0, 0, 1, 1, 2], [0], [0]>} : vector<4x8x4xbf16>, vector<4x4x288xbf16>, vector<4x8x288xf32> -> vector<4x8x288xf32>
    "tpu.trace_stop"() : () -> ()
    %49 = arith.addf %43, %48 : vector<4x8x288xf32>
    %c8 = arith.constant 8 : index
    %c0_59 = arith.constant 0 : index
    %c0_60 = arith.constant 0 : index
    %c0_61 = arith.constant 0 : index
    %50 = vector.load %arg2[%c8, %c0_59, %c0_60, %c0_61] : memref<9x4x8x4xbf16, #tpu.memory_space<vmem>>, vector<1x4x8x4xbf16>
    %51 = vector.shape_cast %50 : vector<1x4x8x4xbf16> to vector<4x8x4xbf16>
    %c0_62 = arith.constant 0 : index
    %c0_63 = arith.constant 0 : index
    %c0_64 = arith.constant 0 : index
    %c38 = arith.constant 38 : index
    %52 = vector.load %arg3[%c0_62, %c0_63, %c0_64, %c38] : memref<1x4x4x342xbf16, #tpu.memory_space<vmem>>, vector<1x4x4x288xbf16>
    %53 = vector.shape_cast %52 : vector<1x4x4x288xbf16> to vector<4x4x288xbf16>
    "tpu.trace_start"() <{level = 10 : i32, message = "nok,nkm->nom"}> : () -> ()
    %cst_65 = arith.constant dense<0.000000e+00> : vector<4x8x288xf32>
    %54 = tpu.matmul %51, %53, %cst_65 {dimension_numbers = #tpu.dot_dimension_numbers<[2], [1], [1], [2], [0, 0, 0, 1, 1, 2], [0], [0]>} : vector<4x8x4xbf16>, vector<4x4x288xbf16>, vector<4x8x288xf32> -> vector<4x8x288xf32>
    "tpu.trace_stop"() : () -> ()
    %55 = arith.addf %49, %54 : vector<4x8x288xf32>
    %c0_66 = arith.constant 0 : index
    %c0_67 = arith.constant 0 : index
    %c0_68 = arith.constant 0 : index
    %56 = vector.load %arg5[%c0_66, %c0_67, %c0_68] : memref<4x8x288xf32, #tpu.memory_space<vmem>>, vector<4x8x288xf32>
    %57 = arith.addf %56, %55 : vector<4x8x288xf32>
    %c0_69 = arith.constant 0 : index
    %c0_70 = arith.constant 0 : index
    %c0_71 = arith.constant 0 : index
    %58 = vector.load %arg5[%c0_69, %c0_70, %c0_71] : memref<4x8x288xf32, #tpu.memory_space<vmem>>, vector<4x8x288xf32>
    tpu.vector_store %arg5[%c0_69, %c0_70, %c0_71], %57 {strides = array<i32>} : memref<4x8x288xf32, #tpu.memory_space<vmem>>, vector<4x8x288xf32>,
    %c0_72 = arith.constant 0 : index
    %c0_73 = arith.constant 0 : index
    %c0_74 = arith.constant 0 : index
    %59 = vector.load %arg5[%c0_72, %c0_73, %c0_74] : memref<4x8x288xf32, #tpu.memory_space<vmem>>, vector<4x8x288xf32>
    %c0_75 = arith.constant 0 : index
    %c0_76 = arith.constant 0 : index
    %c0_77 = arith.constant 0 : index
    %c0_78 = arith.constant 0 : index
    %60 = vector.load %arg4[%c0_75, %c0_76, %c0_77, %c0_78] : memref<1x4x8x288xf32, #tpu.memory_space<vmem>>, vector<1x4x8x288xf32>
    %61 = vector.shape_cast %60 : vector<1x4x8x288xf32> to vector<4x8x288xf32>
    %62 = vector.shape_cast %59 : vector<4x8x288xf32> to vector<1x4x8x288xf32>
    tpu.vector_store %arg4[%c0_75, %c0_76, %c0_77, %c0_78], %62 {strides = array<i32>} : memref<1x4x8x288xf32, #tpu.memory_space<vmem>>, vector<1x4x8x288xf32>,
    return
  }
  func.func @transform_0(%arg0: i32, %arg1: i32) -> (i32, i32, i32, i32) {
    %c0_i32 = arith.constant 0 : i32
    %c0_i32_0 = arith.constant 0 : i32
    %c0_i32_1 = arith.constant 0 : i32
    %c0_i32_2 = arith.constant 0 : i32
    return %c0_i32, %c0_i32_0, %c0_i32_1, %arg1 : i32, i32, i32, i32
  }
  func.func @transform_1(%arg0: i32, %arg1: i32) -> (i32, i32, i32, i32) {
    %c0_i32 = arith.constant 0 : i32
    %c0_i32_0 = arith.constant 0 : i32
    %c0_i32_1 = arith.constant 0 : i32
    return %arg0, %c0_i32, %arg1, %c0_i32_0 : i32, i32, i32, i32
  }
  func.func @transform_2(%arg0: i32, %arg1: i32) -> (i32, i32, i32, i32) {
    %c0_i32 = arith.constant 0 : i32
    %c0_i32_0 = arith.constant 0 : i32
    %c0_i32_1 = arith.constant 0 : i32
    %c0_i32_2 = arith.constant 0 : i32
    return %arg0, %c0_i32, %c0_i32_0, %c0_i32_1 : i32, i32, i32, i32
  }
}

</mosaic_0001>

<bundles_post_ra>
// kernel: tpu_custom_call.1
= control target key start
LH: loop header
LB: loop body
LE: loop exit
PB: predicated region body
PF: predicated region fallthrough
CT: control target
= control target key end

     0   :  { %7 = vsyncpa [#allocation4], 0  ;;  %s6440_s0 = inlined_call_operand.vmem [shape: bf16[9,4,8,4], index: 0, kind: input, shape index: {}]   ;;  %s6441_s1 = inlined_call_operand.vmem [shape: bf16[2,4,4,342], index: 1, kind: input, shape index: {}]   ;;  %s6442_s2 = inlined_call_operand.hbm [shape: f32[2,4,8,288], index: 2, kind: output, shape index: {}]  }
   0x1   :  { %9 = vsyncpa [#allocation4 + $0x1], 0  ;;  %s5416_s9 = smov 0   ;;  %s5418_s10 = smov 0  }
   0x2   :  { %s5420_s11 = smov 0   ;;  %s5422_s12 = smov 0  }
   0x3   :  { %s5424_s13 = smov 0   ;;  %s5426_s14 = smov 0  }
   0x4 LB: > { %s4762_s15 = sadd.s32 4294967295, %s5384_s14   ;;  %s4763_s16 = sadd.s32 4294967294, %s5384_s14   ;;  %s5384_s14 = sphi %s5426_s14, %s15_s14   ;;  %s5380_s13 = sphi %s5424_s13, %s6449_s13   ;;  %s5376_s12 = sphi %s5422_s12, %s6448_s12   ;;  %s5372_s11 = sphi %s5420_s11, %s6447_s11   ;;  %s5368_s10 = sphi %s5418_s10, %s6446_s10   ;;  %s5364_s9 = sphi %s5416_s9, %s6445_s9  }
   0x5   : > { %s27_s17 = sadd.s32 1, %s5380_s13  ;;  %s88_s18 = sadd.s32 1, %s5372_s11 }
   0x6   : > { %p29_p0 = scmp.ge.s32.totalorder %s27_s17, 2  ;;  %p98_p1 = scmp.ne.s32.totalorder %s5372_s11, %s5368_s10 }
   0x7   : > { %p99_p2 = scmp.eq.s32.totalorder %s4762_s15, 1  ;;  %p104_p3 = scmp.ne.s32.totalorder %s5368_s10, %s5364_s9 }
   0x8   : > { %s6451_s17 = smov (%p29_p0, %s27_s17), 0  ;;  %p105_p5 = scmp.eq.s32.totalorder %s4763_s16, 1 }
   0x9   : > { %p5456_p4 = por %p99_p2, %p98_p1  ;;  %s85_s20 = ssub.s32 %s5380_s13, %s6451_s17 }
   0xa   : > { %p4767_p6 = scmp.ge.s32.totalorder %s5384_s14, 1  ;;  %p86_p7 = scmp.eq.s32.totalorder %s85_s20, 0 }
   0xb   : > { %p5463_p8 = por %p105_p5, %p104_p3  ;;  %p142_p9 = scmp.lt.s32.totalorder %s5384_s14, 3 }
   0xc   : > { %s5469_s22 = scalar_select %p86_p7, %s5372_s11, %s88_s18  }
   0xd   : > { %p143_p10 = pnand %p4767_p6, %p142_p9 }
   0xe   : > { %p176_p11 = scmp.lt.s32.totalorder (!%p143_p10), %s5376_s12, 1  ;;  %s5390_s28 = smov (!%p143_p10), 127  }
   0xf   : > { %146 = sbr.rel (%p143_p10) target bundleno = 649 (0x289), region = 28  ;;  %s5391_s29 = smov (!%p143_p10), 126  }
  0x10   : > { %s5392_s30 = smov (!%p143_p10), 110   ;;  %s5393_s3 = smov (!%p143_p10), 109  }
  0x11   : > { %s5394_s4 = smov (!%p143_p10), 108   ;;  %s5395_s7 = smov (!%p143_p10), 92  }
  0x12   : > { %s5396_s26 = smov (!%p143_p10), 91   ;;  %s5397_s6 = smov (!%p143_p10), 90  }
  0x13   : > { %s5202_s18 = smul.u32 (!%p143_p10), 1536, %s5376_s12 }
  0x14   : > { %v225_v0 = vlaneseq  ;;  %v5386_v1 = vmov 1983009808   ;;  %v5387_v3 = vmov 0.0   ;;  %s177_s23 = scalar_select %p176_p11, %s5376_s12, 1  ;;  %vm5388_vm0 = vmmov 0  }
  0x15   : > { %v223_v2 = vunpack.c.l.s4 %v5386_v1  ;;  %4984 = vmatprep.subr.bf16.mxu1 %v5387_v3  ;;  %4986 = vmatprep.mubr.msk.bf16.mxu1 %vm5388_vm0, %v5387_v3  ;;  %v5389_v7 = vmov 0   ;;  %vm250_vm1 = vcmask 1041408   ;;  %vm243_vm2 = vcmask 1039360   ;;  %s6387_s25 = scalar_lea.hbm %s6442_s2, %s5202_s18 }
  0x16   : > { %v226_v4 = vshrl.u32 %v225_v0, 7  ;;  %s5201_s24 = smul.u32 24, %s177_s23  ;;  %292 = vmatprep.mubr.bf16.mxu0 %v5389_v7  ;;  %vm246_vm3 = vcmask 31744   ;;  %vm1167_vm4 = vcmask 1031168   ;;  %vm1661_vm5 = vcmask 900096  }
  0x17   : > { %v224_v5 = vunpack.c.0.s8 %v223_v2  ;;  %vm2155_vm6 = vcmask 891904   ;;  %vm2649_vm7 = vcmask 883712   ;;  %vm3143_vm8 = vcmask 752640  }
  0x18   : > { %s5482_s27 = scalar_lea.vmem %s6441_s1, %s5201_s24  ;;  %vm3637_vm9 = vcmask 744448   ;;  %vm4131_vm10 = vcmask 736256   ;;  %vm192_vm11 = vcmask 261120  }
  0x19   : > { %v5476_v6 = vsub.s32 %v224_v5, %v226_v4  ;;  %v216_v8 = vld [vmem:[%s5482_s27] sm:$0x3f]  ;;  %v217_v9 = vld [vmem:[%s5482_s27 + $0x6] sm:$0x3f]  ;;  %v218_v16 = vld [vmem:[%s5482_s27 + $0xc] sm:$0x3f] }
  0x1a   : > { %v221_v11 = vcombine.high %v216_v8, %v216_v8  ;;  %v342_v15 = vcombine.high %v217_v9, %v217_v9  ;;  %v460_v20 = vcombine.high %v218_v16, %v218_v16  ;;  %v219_v21 = vld [vmem:[%s5482_s27 + $0x12] sm:$0x3f]  ;;  %v1140_v26 = vld [vmem:[%s5482_s27] sm:$0x3f]  ;;  %v1141_v31 = vld [vmem:[%s5482_s27 + $0x6] sm:$0x3f] }
  0x1b   : > { %v228_v10 = vrot.slane %v216_v8, %v5476_v6  ;;  %v349_v14 = vrot.slane %v217_v9, %v5476_v6  ;;  %v467_v19 = vrot.slane %v218_v16, %v5476_v6  ;;  %v585_v24 = vrot.slane %v219_v21, %v5476_v6  ;;  %v1142_v36 = vld [vmem:[%s5482_s27 + $0xc] sm:$0x3f]  ;;  %v1143_v41 = vld [vmem:[%s5482_s27 + $0x12] sm:$0x3f]  ;;  %v1634_v46 = vld [vmem:[%s5482_s27] sm:$0x3f] }
  0x1c   : > { %v235_v13 = vrot.slane %v221_v11, %v5476_v6  ;;  %v356_v18 = vrot.slane %v342_v15, %v5476_v6  ;;  %v474_v23 = vrot.slane %v460_v20, %v5476_v6  ;;  %v578_v25 = vcombine.high %v219_v21, %v219_v21  ;;  %v1635_v51 = vld [vmem:[%s5482_s27 + $0x6] sm:$0x3f]  ;;  %v1636_v56 = vld [vmem:[%s5482_s27 + $0xc] sm:$0x3f]  ;;  %v1637_v61 = vld [vmem:[%s5482_s27 + $0x12] sm:$0x3f] }
  0x1d   : > { %237 = vrot.lane.b32.xlu0 %v228_v10, %s5390_s28  ;;  %v236_v12 = vcombine.high %v228_v10, %v228_v10  ;;  %v357_v17 = vcombine.high %v349_v14, %v349_v14  ;;  %v475_v22 = vcombine.high %v467_v19, %v467_v19  ;;  %v593_v27 = vcombine.high %v585_v24, %v585_v24  ;;  %v2128_v2 = vld [vmem:[%s5482_s27] sm:$0x3f]  ;;  %v2129_v10 = vld [vmem:[%s5482_s27 + $0x6] sm:$0x3f]  ;;  %v2130_v15 = vld [vmem:[%s5482_s27 + $0xc] sm:$0x3f] }
  0x1e   : > { %241 = vrot.lane.b32.xlu1 %v235_v13, %s5390_s28  ;;  %v592_v28 = vrot.slane %v578_v25, %v5476_v6  ;;  %v1152_v29 = vrot.slane %v1140_v26, %v5476_v6  ;;  %v1145_v30 = vcombine.high %v1140_v26, %v1140_v26  ;;  %v1271_v34 = vrot.slane %v1141_v31, %v5476_v6  ;;  %v2131_v20 = vld [vmem:[%s5482_s27 + $0x12] sm:$0x3f]  ;;  %v2622_v25 = vld [vmem:[%s5482_s27] sm:$0x3f] }
  0x1f   : > { %v1264_v35 = vcombine.high %v1141_v31, %v1141_v31  ;;  %v1389_v39 = vrot.slane %v1142_v36, %v5476_v6  ;;  %v1382_v40 = vcombine.high %v1142_v36, %v1142_v36  ;;  %v1507_v44 = vrot.slane %v1143_v41, %v5476_v6  ;;  %193 = vst.msk [vmem:[#allocation2 + $0x10] sm:$0xff] %vm192_vm11, %v5387_v3 }
  0x20   : > { %v1160_v32 = vcombine.high %v1152_v29, %v1152_v29  ;;  %v1159_v33 = vrot.slane %v1145_v30, %v5476_v6  ;;  %v1279_v37 = vcombine.high %v1271_v34, %v1271_v34  ;;  %v1500_v45 = vcombine.high %v1143_v41, %v1143_v41  ;;  %v2623_v30 = vld [vmem:[%s5482_s27 + $0x6] sm:$0x3f]  ;;  %196 = vst.msk [vmem:[#allocation2 + $0x28] sm:$0xff] %vm192_vm11, %v5387_v3 }
  0x21   : > { %239 = vrot.lane.b32.xlu0 %v236_v12, %s5390_s28  ;;  %v1278_v38 = vrot.slane %v1264_v35, %v5476_v6  ;;  %v1397_v42 = vcombine.high %v1389_v39, %v1389_v39  ;;  %v1396_v43 = vrot.slane %v1382_v40, %v5476_v6  ;;  %v1515_v47 = vcombine.high %v1507_v44, %v1507_v44  ;;  %v2624_v35 = vld [vmem:[%s5482_s27 + $0xc] sm:$0x3f]  ;;  %v2625_v40 = vld [vmem:[%s5482_s27 + $0x12] sm:$0x3f] }
  0x22   : > { %358 = vrot.lane.b32.xlu1 %v349_v14, %s5390_s28  ;;  %v1514_v48 = vrot.slane %v1500_v45, %v5476_v6  ;;  %v1646_v49 = vrot.slane %v1634_v46, %v5476_v6  ;;  %v1639_v50 = vcombine.high %v1634_v46, %v1634_v46  ;;  %v1765_v54 = vrot.slane %v1635_v51, %v5476_v6  ;;  %v3116_v45 = vld [vmem:[%s5482_s27] sm:$0x3f] }
  0x23   : > { %v1758_v55 = vcombine.high %v1635_v51, %v1635_v51  ;;  %v1883_v59 = vrot.slane %v1636_v56, %v5476_v6  ;;  %v1876_v60 = vcombine.high %v1636_v56, %v1636_v56  ;;  %v2001_v0 = vrot.slane %v1637_v61, %v5476_v6  ;;  %199 = vst.msk [vmem:[#allocation2 + $0x40] sm:$0xff] %vm192_vm11, %v5387_v3 }
  0x24   : > { %v1654_v52 = vcombine.high %v1646_v49, %v1646_v49  ;;  %v1653_v53 = vrot.slane %v1639_v50, %v5476_v6  ;;  %v1773_v57 = vcombine.high %v1765_v54, %v1765_v54  ;;  %v1994_v1 = vcombine.high %v1637_v61, %v1637_v61  ;;  %202 = vst.msk [vmem:[#allocation2 + $0x58] sm:$0xff] %vm192_vm11, %v5387_v3 }
  0x25   : > { %360 = vrot.lane.b32.xlu0 %v357_v17, %s5390_s28  ;;  %v1772_v58 = vrot.slane %v1758_v55, %v5476_v6  ;;  %v1891_v62 = vcombine.high %v1883_v59, %v1883_v59  ;;  %v1890_v63 = vrot.slane %v1876_v60, %v5476_v6  ;;  %v2009_v4 = vcombine.high %v2001_v0, %v2001_v0  ;;  %v4769_v55 = vld [vmem:[%s6440_s0 + $0x10] sm:$0xf] }
  0x26   : > { %362 = vrot.lane.b32.xlu1 %v356_v18, %s5390_s28  ;;  %v2008_v5 = vrot.slane %v1994_v1, %v5476_v6  ;;  %v2140_v8 = vrot.slane %v2128_v2, %v5476_v6  ;;  %v2133_v9 = vcombine.high %v2128_v2, %v2128_v2  ;;  %v2259_v13 = vrot.slane %v2129_v10, %v5476_v6 }
  0x27   : > { %v2252_v14 = vcombine.high %v2129_v10, %v2129_v10  ;;  %v2377_v18 = vrot.slane %v2130_v15, %v5476_v6  ;;  %v3121_v51 = vcombine.high %v3116_v45, %v3116_v45  ;;  %v4770_v10 = vld [vmem:[%s6440_s0 + $0x14] sm:$0xf] }
  0x28   : > { %v2148_v11 = vcombine.high %v2140_v8, %v2140_v8  ;;  %v2147_v12 = vrot.slane %v2133_v9, %v5476_v6  ;;  %v2267_v16 = vcombine.high %v2259_v13, %v2259_v13 }
  0x29   : > { %476 = vrot.lane.b32.xlu0 %v467_v19, %s5390_s28  ;;  %v2266_v17 = vrot.slane %v2252_v14, %v5476_v6  ;;  %v2370_v19 = vcombine.high %v2130_v15, %v2130_v15  ;;  %v2385_v21 = vcombine.high %v2377_v18, %v2377_v18  ;;  %v3135_v61 = vrot.slane %v3121_v51, %v5476_v6 }
  0x2a   : > { %478 = vrot.lane.b32.xlu1 %v475_v22, %s5390_s28 }
  0x2b   : > { %v2384_v22 = vrot.slane %v2370_v19, %v5476_v6 }
  0x2d   : > { %480 = vrot.lane.b32.xlu0 %v474_v23, %s5390_s28  ;;  %v2495_v23 = vrot.slane %v2131_v20, %v5476_v6 }
  0x2e   : > { %594 = vrot.lane.b32.xlu1 %v585_v24, %s5390_s28  ;;  %v2488_v24 = vcombine.high %v2131_v20, %v2131_v20 }
  0x2f   : > { %v2503_v26 = vcombine.high %v2495_v23, %v2495_v23 }
  0x31   : > { %596 = vrot.lane.b32.xlu0 %v593_v27, %s5390_s28  ;;  %v2502_v27 = vrot.slane %v2488_v24, %v5476_v6  ;;  %v4771_v24 = vld [vmem:[%s6440_s0 + $0x18] sm:$0xf] }
  0x32   : > { %598 = vrot.lane.b32.xlu1 %v592_v28, %s5390_s28  ;;  %v2634_v28 = vrot.slane %v2622_v25, %v5476_v6  ;;  %s5398_s28 = smov [#allocation3]  }
  0x34   : > { %v2642_v31 = vcombine.high %v2634_v28, %v2634_v28 }
  0x35   : > { %1161 = vrot.lane.b32.xlu0 %v1152_v29, %s5391_s29  ;;  %v2627_v29 = vcombine.high %v2622_v25, %v2622_v25 }
  0x36   : > { %1163 = vrot.lane.b32.xlu1 %v1160_v32, %s5391_s29 }
  0x37   : > { %v2641_v32 = vrot.slane %v2627_v29, %v5476_v6 }
  0x39   : > { %1165 = vrot.lane.b32.xlu0 %v1159_v33, %s5391_s29  ;;  %v2753_v33 = vrot.slane %v2623_v30, %v5476_v6 }
  0x3a   : > { %1280 = vrot.lane.b32.xlu1 %v1271_v34, %s5391_s29  ;;  %v2746_v34 = vcombine.high %v2623_v30, %v2623_v30 }
  0x3b   : > { %v2761_v36 = vcombine.high %v2753_v33, %v2753_v33 }
  0x3d   : > { %1282 = vrot.lane.b32.xlu0 %v1279_v37, %s5391_s29  ;;  %v2760_v37 = vrot.slane %v2746_v34, %v5476_v6 }
  0x3e   : > { %1284 = vrot.lane.b32.xlu1 %v1278_v38, %s5391_s29  ;;  %v2871_v38 = vrot.slane %v2624_v35, %v5476_v6 }
  0x40   : > { %v2879_v41 = vcombine.high %v2871_v38, %v2871_v38 }
  0x41   : > { %1398 = vrot.lane.b32.xlu0 %v1389_v39, %s5391_s29  ;;  %v2864_v39 = vcombine.high %v2624_v35, %v2624_v35 }
  0x42   : > { %1400 = vrot.lane.b32.xlu1 %v1397_v42, %s5391_s29 }
  0x43   : > { %v2878_v42 = vrot.slane %v2864_v39, %v5476_v6  ;;  %v208_v39 = vld [vmem:[%s5482_s27 + $0x6] sm:$0x3f] }
  0x45   : > { %1402 = vrot.lane.b32.xlu0 %v1396_v43, %s5391_s29  ;;  %v2989_v43 = vrot.slane %v2625_v40, %v5476_v6 }
  0x46   : > { %1516 = vrot.lane.b32.xlu1 %v1507_v44, %s5391_s29  ;;  %v2982_v44 = vcombine.high %v2625_v40, %v2625_v40 }
  0x47   : > { %v2997_v46 = vcombine.high %v2989_v43, %v2989_v43 }
  0x49   : > { %1518 = vrot.lane.b32.xlu0 %v1515_v47, %s5391_s29 }
  0x4a   : > { %1520 = vrot.lane.b32.xlu1 %v1514_v48, %s5391_s29  ;;  %v2996_v48 = vrot.slane %v2982_v44, %v5476_v6  ;;  %s5312_s29 = sshll.u32 %s5398_s28, 4  ;;  %s5313_s29 = int_to_ptr.vmem [resolvable:$false] %s5312_s29 }
  0x4d   : > { %1655 = vrot.lane.b32.xlu0 %v1646_v49, %s5392_s30  ;;  %v3128_v49 = vrot.slane %v3116_v45, %v5476_v6  ;;  %v806_v45 = vcombine.high %v208_v39, %v208_v39 }
  0x4e   : > { %1657 = vrot.lane.b32.xlu1 %v1654_v52, %s5392_s30 }
  0x4f   : > { %v3136_v56 = vcombine.high %v3128_v49, %v3128_v49  ;;  %v820_v51 = vrot.slane %v806_v45, %v5476_v6 }
  0x51   : > { %1659 = vrot.lane.b32.xlu0 %v1653_v53, %s5392_s30  ;;  %v3117_v53 = vld [vmem:[%s5482_s27 + $0x6] sm:$0x3f] }
  0x52   : > { %1774 = vrot.lane.b32.xlu1 %v1765_v54, %s5392_s30 }
  0x55   : > { %1776 = vrot.lane.b32.xlu0 %v1773_v57, %s5392_s30 }
  0x56   : > { %1778 = vrot.lane.b32.xlu1 %v1772_v58, %s5392_s30 }
  0x59   : > { %1892 = vrot.lane.b32.xlu0 %v1883_v59, %s5392_s30 }
  0x5a   : > { %1894 = vrot.lane.b32.xlu1 %v1891_v62, %s5392_s30  ;;  %v3247_v62 = vrot.slane %v3117_v53, %v5476_v6 }
  0x5c   : > { %v3255_v2 = vcombine.high %v3247_v62, %v3247_v62 }
  0x5d   : > { %1896 = vrot.lane.b32.xlu0 %v1890_v63, %s5392_s30 }
  0x5e   : > { %2010 = vrot.lane.b32.xlu1 %v2001_v0, %s5392_s30 }
  0x61   : > { %2012 = vrot.lane.b32.xlu0 %v2009_v4, %s5392_s30 }
  0x62   : > { %2014 = vrot.lane.b32.xlu1 %v2008_v5, %s5392_s30  ;;  %s5314_s30 = scalar_lea.vmem %s5313_s29, 3072 }
  0x65   : > { %2149 = vrot.lane.b32.xlu0 %v2140_v8, %s5393_s3 }
  0x66   : > { %2151 = vrot.lane.b32.xlu1 %v2148_v11, %s5393_s3  ;;  %v3240_v11 = vcombine.high %v3117_v53, %v3117_v53  ;;  %v209_v53 = vld [vmem:[%s5482_s27 + $0xc] sm:$0x3f] }
  0x69   : > { %2153 = vrot.lane.b32.xlu0 %v2147_v12, %s5393_s3 }
  0x6a   : > { %2268 = vrot.lane.b32.xlu1 %v2259_v13, %s5393_s3  ;;  %v3118_v13 = vld [vmem:[%s5482_s27 + $0xc] sm:$0x3f] }
  0x6b   : > { %v3365_v19 = vrot.slane %v3118_v13, %v5476_v6 }
  0x6d   : > { %2270 = vrot.lane.b32.xlu0 %v2267_v16, %s5393_s3  ;;  %v3373_v30 = vcombine.high %v3365_v19, %v3365_v19 }
  0x6e   : > { %2272 = vrot.lane.b32.xlu1 %v2266_v17, %s5393_s3 }
  0x71   : > { %2386 = vrot.lane.b32.xlu0 %v2377_v18, %s5393_s3  ;;  %v3254_v18 = vrot.slane %v3240_v11, %v5476_v6 }
  0x72   : > { %2388 = vrot.lane.b32.xlu1 %v2385_v21, %s5393_s3 }
  0x75   : > { %2390 = vrot.lane.b32.xlu0 %v2384_v22, %s5393_s3  ;;  %v207_v22 = vld [vmem:[%s5482_s27] sm:$0x3f] }
  0x76   : > { %2504 = vrot.lane.b32.xlu1 %v2495_v23, %s5393_s3  ;;  %v703_v25 = vrot.slane %v207_v22, %v5476_v6 }
  0x78   : > { %v711_v35 = vcombine.high %v703_v25, %v703_v25 }
  0x79   : > { %2506 = vrot.lane.b32.xlu0 %v2503_v26, %s5393_s3  ;;  %v3358_v26 = vcombine.high %v3118_v13, %v3118_v13 }
  0x7a   : > { %2508 = vrot.lane.b32.xlu1 %v2502_v27, %s5393_s3 }
  0x7d   : > { %2643 = vrot.lane.b32.xlu0 %v2634_v28, %s5394_s4  ;;  %v696_v28 = vcombine.high %v207_v22, %v207_v22 }
  0x7e   : > { %2645 = vrot.lane.b32.xlu1 %v2642_v31, %s5394_s4  ;;  %v3119_v31 = vld [vmem:[%s5482_s27 + $0x12] sm:$0x3f] }
  0x7f   : > { %v3476_v40 = vcombine.high %v3119_v31, %v3119_v31 }
  0x81   : > { %2647 = vrot.lane.b32.xlu0 %v2641_v32, %s5394_s4 }
  0x82   : > { %2762 = vrot.lane.b32.xlu1 %v2753_v33, %s5394_s4 }
  0x85   : > { %2764 = vrot.lane.b32.xlu0 %v2761_v36, %s5394_s4  ;;  %v3372_v36 = vrot.slane %v3358_v26, %v5476_v6  ;;  %v205_v26 = vld [vmem:[%s6440_s0 + $0x8] sm:$0xf] }
  0x86   : > { %2766 = vrot.lane.b32.xlu1 %v2760_v37, %s5394_s4  ;;  %v710_v37 = vrot.slane %v696_v28, %v5476_v6 }
  0x88   : > { %v722_v44 = vsel %vm250_vm1, %v710_v37, 0 }
  0x89   : > { %2880 = vrot.lane.b32.xlu0 %v2871_v38, %s5394_s4  ;;  %v3483_v38 = vrot.slane %v3119_v31, %v5476_v6 }
  0x8a   : > { %2882 = vrot.lane.b32.xlu1 %v2879_v41, %s5394_s4  ;;  %v3610_v41 = vld [vmem:[%s5482_s27] sm:$0x3f] }
  0x8d   : > { %2884 = vrot.lane.b32.xlu0 %v2878_v42, %s5394_s4  ;;  %v4772_v42 = vld [vmem:[%s6440_s0 + $0x1c] sm:$0xf] }
  0x8e   : > { %2998 = vrot.lane.b32.xlu1 %v2989_v43, %s5394_s4  ;;  %v813_v43 = vrot.slane %v208_v39, %v5476_v6  ;;  %v206_v39 = vld [vmem:[%s6440_s0 + $0xc] sm:$0xf] }
  0x8f   : > { %v238_v47 = vpop.permute.xlu0 %237 }
  0x90   : > { %v242_v50 = vpop.permute.xlu1 %241 }
  0x91   : > { %3000 = vrot.lane.b32.xlu0 %v2997_v46, %s5394_s4  ;;  %v258_v52 = vsel %vm250_vm1, %v242_v50, 0  ;;  %v3491_v46 = vcombine.high %v3483_v38, %v3483_v38 }
  0x92   : > { %4985 = vmatpush3.bf16.msra.mxu1 %v258_v52  ;;  %3002 = vrot.lane.b32.xlu1 %v2996_v48, %s5394_s4  ;;  %v3622_v48 = vrot.slane %v3610_v41, %v5476_v6  ;;  %v3615_v52 = vcombine.high %v3610_v41, %v3610_v41 }
  0x93   : > { %v240_v54 = vpop.permute.xlu0 %239  ;;  %4990 = vmatprep.subr.bf16.mxu1 %v5387_v3 }
  0x94   : > { %v245_v57 = vsel %vm243_vm2, %v240_v54, %v242_v50  ;;  %v244_v58 = vsel %vm243_vm2, %v238_v47, %v240_v54  ;;  %v359_v59 = vpop.permute.xlu1 %358  ;;  %v3490_v47 = vrot.slane %v3476_v40, %v5476_v6  ;;  %v821_v50 = vcombine.high %v813_v43, %v813_v43 }
  0x95   : > { %4773 = vmatprep.subr.msk.bf16.mxu0 %vm250_vm1, %v245_v57  ;;  %v252_v60 = vsel %vm250_vm1, %v244_v58, 0  ;;  %3137 = vrot.lane.b32.xlu0 %v3128_v49, %s5395_s7  ;;  %v716_v49 = vsel %vm250_vm1, %v703_v25, 0  ;;  %v3630_v54 = vcombine.high %v3622_v48, %v3622_v48  ;;  %v923_v57 = vrot.slane %v209_v53, %v5476_v6  ;;  %v4104_v25 = vld [vmem:[%s5482_s27] sm:$0x3f] }
  0x96   : > { %275 = vmatpush1.bf16.msra.mxu0 %v252_v60  ;;  %4987 = vmatmul.mubr.msk.bf16.vlgmr.msra.gmra.mxu1 %vm246_vm3, %v4769_v55  ;;  %v832_v58 = vsel %vm250_vm1, %v820_v51, 0  ;;  %v3629_v60 = vrot.slane %v3615_v52, %v5476_v6  ;;  %v4116_v31 = vrot.slane %v4104_v25, %v5476_v6 }
  0x97   : > { %v361_v63 = vpop.permute.xlu0 %360  ;;  %4992 = vmatprep.mubr.msk.bf16.mxu1 %vm5388_vm0, %v5387_v3  ;;  %3139 = vrot.lane.b32.xlu1 %v3136_v56, %s5395_s7  ;;  %v203_v56 = vld [vmem:[%s6440_s0] sm:$0xf] }
  0x98   : > { %v364_v0 = vsel %vm243_vm2, %v359_v59, %v361_v63  ;;  %v363_v1 = vpop.permute.xlu1 %362  ;;  %v916_v59 = vcombine.high %v209_v53, %v209_v53  ;;  %v4124_v37 = vcombine.high %v4116_v31, %v4116_v31 }
  0x99   : > { %4774 = vmatmul.mubr.msk.bf16.vlgmr.msra.gmra.mxu0 %vm246_vm3, %v4769_v55  ;;  %3141 = vrot.lane.b32.xlu0 %v3135_v61, %s5395_s7  ;;  %v365_v4 = vsel %vm243_vm2, %v361_v63, %v363_v1  ;;  %v376_v5 = vsel %vm250_vm1, %v363_v1, 0  ;;  %v370_v8 = vsel %vm250_vm1, %v364_v0, 0  ;;  %v3611_v55 = vld [vmem:[%s5482_s27 + $0x6] sm:$0x3f]  ;;  %v3612_v63 = vld [vmem:[%s5482_s27 + $0xc] sm:$0x3f]  ;;  %v931_v1 = vcombine.high %v923_v57, %v923_v57 }
  0x9a   : > { %410 = vmatprep.mubr.bf16.mxu0 %v5389_v7  ;;  %4776 = vmatprep.subr.msk.bf16.mxu0 %vm250_vm1, %v365_v4  ;;  %v3741_v61 = vrot.slane %v3611_v55, %v5476_v6  ;;  %v826_v0 = vsel %vm250_vm1, %v813_v43, 0 }
  0x9b   : > { %v477_v9 = vpop.permute.xlu0 %476  ;;  %4991 = vmatpush3.bf16.msra.mxu1 %v376_v5  ;;  %393 = vmatpush1.bf16.msra.mxu0 %v370_v8  ;;  %v210_v5 = vld [vmem:[%s5482_s27 + $0x12] sm:$0x3f] }
  0x9c   : > { %4996 = vmatprep.subr.bf16.mxu1 %v5387_v3  ;;  %v479_v12 = vpop.permute.xlu1 %478  ;;  %3256 = vrot.lane.b32.xlu1 %v3247_v62, %s5395_s7  ;;  %v3734_v62 = vcombine.high %v3611_v55, %v3611_v55  ;;  %v3749_v4 = vcombine.high %v3741_v61, %v3741_v61  ;;  %v1033_v11 = vrot.slane %v210_v5, %v5476_v6 }
  0x9d   : > { %3258 = vrot.lane.b32.xlu0 %v3255_v2, %s5395_s7  ;;  %v482_v14 = vsel %vm243_vm2, %v477_v9, %v479_v12  ;;  %v930_v2 = vrot.slane %v916_v59, %v5476_v6  ;;  %v3859_v9 = vrot.slane %v3612_v63, %v5476_v6  ;;  %v1026_v13 = vcombine.high %v210_v5, %v210_v5  ;;  %v4798_v5 = vld [vmem:[%s6440_s0 + $0x24] sm:$0xf] }
  0x9e   : > { %4993 = vmatmul.mubr.msk.bf16.vlgmr.msra.gmra.mxu1 %vm246_vm3, %v4770_v10  ;;  %v488_v20 = vsel %vm250_vm1, %v482_v14, 0  ;;  %v3748_v8 = vrot.slane %v3734_v62, %v5476_v6  ;;  %v3852_v14 = vcombine.high %v3612_v63, %v3612_v63 }
  0x9f   : > { %v481_v15 = vpop.permute.xlu0 %480  ;;  %4998 = vmatprep.mubr.msk.bf16.mxu1 %vm5388_vm0, %v5387_v3 }
  0xa0   : > { %v483_v16 = vsel %vm243_vm2, %v479_v12, %v481_v15  ;;  %v494_v17 = vsel %vm250_vm1, %v481_v15, 0  ;;  %v595_v21 = vpop.permute.xlu1 %594  ;;  %3260 = vrot.lane.b32.xlu1 %v3254_v18, %s5395_s7  ;;  %v942_v12 = vsel %vm250_vm1, %v930_v2, 0  ;;  %v3867_v15 = vcombine.high %v3859_v9, %v3859_v9 }
  0xa1   : > { %4777 = vmatmul.mubr.msk.bf16.vlgmr.msra.gmra.mxu0 %vm246_vm3, %v4770_v10  ;;  %4779 = vmatprep.subr.msk.bf16.mxu0 %vm250_vm1, %v483_v16  ;;  %v204_v10 = vld [vmem:[%s6440_s0 + $0x4] sm:$0xf]  ;;  %v3613_v16 = vld [vmem:[%s5482_s27 + $0x12] sm:$0x3f] }
  0xa2   : > { %511 = vmatpush1.bf16.msra.mxu0 %v488_v20  ;;  %4997 = vmatpush3.bf16.msra.mxu1 %v494_v17  ;;  %v936_v17 = vsel %vm250_vm1, %v923_v57, 0  ;;  %v1040_v20 = vrot.slane %v1026_v13, %v5476_v6  ;;  %v3977_v22 = vrot.slane %v3613_v16, %v5476_v6 }
  0xa3   : > { %v597_v23 = vpop.permute.xlu0 %596  ;;  %528 = vmatprep.mubr.bf16.mxu0 %v5389_v7  ;;  %5002 = vmatprep.subr.bf16.mxu1 %v5387_v3 }
  0xa4   : > { %v600_v27 = vsel %vm243_vm2, %v595_v21, %v597_v23  ;;  %3374 = vrot.lane.b32.xlu0 %v3365_v19, %s5395_s7  ;;  %v599_v29 = vpop.permute.xlu1 %598  ;;  %3376 = vrot.lane.b32.xlu1 %v3373_v30, %s5395_s7  ;;  %v1041_v19 = vcombine.high %v1033_v11, %v1033_v11  ;;  %v3866_v21 = vrot.slane %v3852_v14, %v5476_v6 }
  0xa5   : > { %v601_v32 = vsel %vm243_vm2, %v597_v23, %v599_v29  ;;  %v612_v33 = vsel %vm250_vm1, %v599_v29, 0  ;;  %v606_v34 = vsel %vm250_vm1, %v600_v27, 0  ;;  %v1052_v27 = vsel %vm250_vm1, %v1040_v20, 0 }
  0xa6   : > { %4999 = vmatmul.mubr.msk.bf16.vlgmr.msra.gmra.mxu1 %vm246_vm3, %v4771_v24  ;;  %4782 = vmatprep.subr.msk.bf16.mxu0 %vm250_vm1, %v601_v32  ;;  %v3985_v28 = vcombine.high %v3977_v22, %v3977_v22  ;;  %v1046_v32 = vsel %vm250_vm1, %v1033_v11, 0 }
  0xa7   : > { %5003 = vmatpush3.bf16.msra.mxu1 %v612_v33  ;;  %5004 = vmatprep.mubr.msk.bf16.mxu1 %vm5388_vm0, %v5387_v3  ;;  %v1162_v18 = vpop.permute.xlu0 %1161 }
  0xa8   : > { %5008 = vmatprep.subr.bf16.mxu1 %v5387_v3  ;;  %3378 = vrot.lane.b32.xlu0 %v3372_v36, %s5395_s7  ;;  %v1164_v23 = vpop.permute.xlu1 %1163 }
  0xa9   : > { %4780 = vmatmul.mubr.msk.bf16.vlgmr.msra.gmra.mxu0 %vm246_vm3, %v4771_v24  ;;  %3492 = vrot.lane.b32.xlu1 %v3483_v38, %s5395_s7  ;;  %v3970_v24 = vcombine.high %v3613_v16, %v3613_v16  ;;  %v4105_v38 = vld [vmem:[%s5482_s27 + $0x6] sm:$0x3f]  ;;  %v1168_v40 = vsel %vm1167_vm4, %v1162_v18, %v1164_v23 }
  0xaa   : > { %629 = vmatpush1.bf16.msra.mxu0 %v606_v34  ;;  %646 = vmatprep.mubr.bf16.mxu0 %v5389_v7  ;;  %v4235_v43 = vrot.slane %v4105_v38, %v5476_v6  ;;  %v4228_v45 = vcombine.high %v4105_v38, %v4105_v38 }
  0xab   : > { %4785 = vmatprep.subr.msk.bf16.mxu0 %vm250_vm1, %v711_v35  ;;  %v1166_v29 = vpop.permute.xlu0 %1165  ;;  %v3984_v30 = vrot.slane %v3970_v24, %v5476_v6  ;;  %v4109_v35 = vcombine.high %v4104_v25, %v4104_v25  ;;  %v4800_v24 = vld [vmem:[%s6440_s0 + $0x2c] sm:$0xf] }
  0xac   : > { %3494 = vrot.lane.b32.xlu0 %v3491_v46, %s5395_s7  ;;  %v1281_v33 = vpop.permute.xlu1 %1280  ;;  %v1169_v34 = vsel %vm1167_vm4, %v1164_v23, %v1166_v29  ;;  %v1180_v41 = vsel %vm250_vm1, %v1166_v29, 0  ;;  %v4106_v46 = vld [vmem:[%s5482_s27 + $0xc] sm:$0x3f]  ;;  %v4242_v52 = vrot.slane %v4228_v45, %v5476_v6 }
  0xad   : > { %3496 = vrot.lane.b32.xlu1 %v3490_v47, %s5395_s7  ;;  %v1174_v47 = vsel %vm250_vm1, %v1168_v40, 0  ;;  %v4353_v53 = vrot.slane %v4106_v46, %v5476_v6  ;;  %v4346_v57 = vcombine.high %v4106_v46, %v4106_v46  ;;  %v4814_v40 = vld [vmem:[%s6440_s0 + $0x34] sm:$0xf] }
  0xae   : > { %5005 = vmatmul.mubr.msk.bf16.vlgmr.msra.gmra.mxu1 %vm246_vm3, %v4772_v42 }
  0xaf   : > { %5009 = vmatpush3.bf16.msra.mxu1 %v722_v44  ;;  %5010 = vmatprep.mubr.msk.bf16.mxu1 %vm5388_vm0, %v5387_v3  ;;  %v1283_v36 = vpop.permute.xlu0 %1282  ;;  %v4361_v59 = vcombine.high %v4353_v53, %v4353_v53 }
  0xb0   : > { %5014 = vmatprep.subr.bf16.mxu1 %v5387_v3  ;;  %3631 = vrot.lane.b32.xlu0 %v3622_v48, %s5396_s26  ;;  %v1285_v44 = vpop.permute.xlu1 %1284  ;;  %v1286_v55 = vsel %vm1167_vm4, %v1281_v33, %v1283_v36 }
  0xb1   : > { %4783 = vmatmul.mubr.msk.bf16.vlgmr.msra.gmra.mxu0 %vm246_vm3, %v4772_v42  ;;  %3633 = vrot.lane.b32.xlu1 %v3630_v54, %s5396_s26  ;;  %v4123_v42 = vrot.slane %v4109_v35, %v5476_v6  ;;  %v4797_v54 = vld [vmem:[%s6440_s0 + $0x20] sm:$0xf] }
  0xb2   : > { %739 = vmatpush1.bf16.msra.mxu0 %v716_v49  ;;  %756 = vmatprep.mubr.bf16.mxu0 %v5389_v7  ;;  %v1287_v49 = vsel %vm1167_vm4, %v1283_v36, %v1285_v44 }
  0xb3   : > { %4788 = vmatprep.subr.msk.bf16.mxu0 %vm250_vm1, %v821_v50  ;;  %v1399_v48 = vpop.permute.xlu0 %1398  ;;  %v4243_v50 = vcombine.high %v4235_v43, %v4235_v43 }
  0xb4   : > { %3635 = vrot.lane.b32.xlu0 %v3629_v60, %s5396_s26  ;;  %v1401_v51 = vpop.permute.xlu1 %1400  ;;  %v4107_v60 = vld [vmem:[%s5482_s27 + $0x12] sm:$0x3f]  ;;  %s169_s27 = sand.u32 1, %s5368_s10  }
  0xb5   : > { %3750 = vrot.lane.b32.xlu1 %v3741_v61, %s5396_s26  ;;  %v1292_v61 = vsel %vm250_vm1, %v1286_v55, 0  ;;  %s5200_s15 = smul.u32 96, %s169_s27  ;;  %s6395_s12 = scalar_lea.sflag [#allocation4], %s169_s27 }
  0xb6   : > { %5011 = vmatmul.mubr.msk.bf16.vlgmr.msra.gmra.mxu1 %vm246_vm3, %v203_v56 }
  0xb7   : > { %5015 = vmatpush3.bf16.msra.mxu1 %v832_v58  ;;  %5016 = vmatprep.mubr.msk.bf16.mxu1 %vm5388_vm0, %v5387_v3  ;;  %v1403_v58 = vpop.permute.xlu0 %1402  ;;  %s6343_s16 = scalar_lea.vmem [#allocation3], %s5200_s15 }
  0xb8   : > { %5020 = vmatprep.subr.bf16.mxu1 %v5387_v3  ;;  %3752 = vrot.lane.b32.xlu0 %v3749_v4, %s5396_s26  ;;  %v1517_v62 = vpop.permute.xlu1 %1516  ;;  %v1405_v63 = vsel %vm1167_vm4, %v1401_v51, %v1403_v58  ;;  %v4464_v4 = vcombine.high %v4107_v60, %v4107_v60  ;;  %s4668_s20 = sshll.u32 %s6343_s16, 4  ;;  %s6389_s20 = int_to_ptr.vmem [resolvable:$true] %s4668_s20 }
  0xb9   : > { %4786 = vmatmul.mubr.msk.bf16.vlgmr.msra.gmra.mxu0 %vm246_vm3, %v203_v56  ;;  %3754 = vrot.lane.b32.xlu1 %v3748_v8, %s5396_s26  ;;  %v1298_v56 = vsel %vm250_vm1, %v1285_v44, 0  ;;  %v1404_v8 = vsel %vm1167_vm4, %v1399_v48, %v1401_v51  ;;  %v4815_v48 = vld [vmem:[%s6440_s0 + $0x38] sm:$0xf]  ;;  %p5315_p1 = scmp.lt.s32.totalorder %s6389_s20, %s5313_s29 }
  0xba   : > { %849 = vmatpush1.bf16.msra.mxu0 %v826_v0  ;;  %866 = vmatprep.mubr.bf16.mxu0 %v5389_v7  ;;  %v4360_v0 = vrot.slane %v4346_v57, %v5476_v6  ;;  %v1410_v13 = vsel %vm250_vm1, %v1404_v8, 0 }
  0xbb   : > { %4791 = vmatprep.subr.msk.bf16.mxu0 %vm250_vm1, %v931_v1  ;;  %v4471_v1 = vrot.slane %v4107_v60, %v5476_v6  ;;  %v1519_v2 = vpop.permute.xlu0 %1518 }
  0xbc   : > { %3868 = vrot.lane.b32.xlu0 %v3859_v9, %s5396_s26  ;;  %v1416_v9 = vsel %vm250_vm1, %v1403_v58, 0  ;;  %v1521_v11 = vpop.permute.xlu1 %1520 }
  0xbd   : > { %3870 = vrot.lane.b32.xlu1 %v3867_v15, %s5396_s26  ;;  %v1523_v15 = vsel %vm1167_vm4, %v1519_v2, %v1521_v11  ;;  %v1534_v18 = vsel %vm250_vm1, %v1521_v11, 0  ;;  %v4830_v11 = vld [vmem:[%s6440_s0 + $0x44] sm:$0xf] }
  0xbe   : > { %5017 = vmatmul.mubr.msk.bf16.vlgmr.msra.gmra.mxu1 %vm246_vm3, %v204_v10 }
  0xbf   : > { %5021 = vmatpush3.bf16.msra.mxu1 %v942_v12  ;;  %5022 = vmatprep.mubr.msk.bf16.mxu1 %vm5388_vm0, %v5387_v3  ;;  %v4478_v12 = vrot.slane %v4464_v4, %v5476_v6  ;;  %v1656_v14 = vpop.permute.xlu0 %1655  ;;  %v4799_v6 = vld [vmem:[%s6440_s0 + $0x28] sm:$0xf] }
  0xc0   : > { %5026 = vmatprep.subr.bf16.mxu1 %v5387_v3  ;;  %3872 = vrot.lane.b32.xlu0 %v3866_v21, %s5396_s26  ;;  %v1658_v16 = vpop.permute.xlu1 %1657 }
  0xc1   : > { %4789 = vmatmul.mubr.msk.bf16.vlgmr.msra.gmra.mxu0 %vm246_vm3, %v204_v10  ;;  %3986 = vrot.lane.b32.xlu1 %v3977_v22, %s5396_s26  ;;  %v4479_v10 = vcombine.high %v4471_v1, %v4471_v1  ;;  %v1662_v25 = vsel %vm1661_vm5, %v1656_v14, %v1658_v16 }
  0xc2   : > { %959 = vmatpush1.bf16.msra.mxu0 %v936_v17  ;;  %976 = vmatprep.mubr.bf16.mxu0 %v5389_v7  ;;  %v1522_v17 = vsel %vm1167_vm4, %v1517_v62, %v1519_v2 }
  0xc3   : > { %4794 = vmatprep.subr.msk.bf16.mxu0 %vm250_vm1, %v1041_v19  ;;  %v1660_v19 = vpop.permute.xlu0 %1659  ;;  %v1528_v20 = vsel %vm250_vm1, %v1522_v17, 0 }
  0xc4   : > { %3988 = vrot.lane.b32.xlu0 %v3985_v28, %s5396_s26  ;;  %v1775_v21 = vpop.permute.xlu1 %1774  ;;  %v1663_v22 = vsel %vm1661_vm5, %v1658_v16, %v1660_v19  ;;  %v1668_v28 = vsel %vm250_vm1, %v1662_v25, 0 }
  0xc5   : > { %3990 = vrot.lane.b32.xlu1 %v3984_v30, %s5396_s26  ;;  %s5308_s26 = scalar_lea.vmem %s6389_s20, 1536 }
  0xc6   : > { %5023 = vmatmul.mubr.msk.bf16.vlgmr.msra.gmra.mxu1 %vm246_vm3, %v205_v26  ;;  %p5309_p12 = scmp.ne.s32.totalorder %s6389_s20, %s5308_s26  ;;  %p5316_p2 = scmp.lt.s32.totalorder %s5314_s30, %s5308_s26 }
  0xc7   : > { %5027 = vmatpush3.bf16.msra.mxu1 %v1052_v27  ;;  %5028 = vmatprep.mubr.msk.bf16.mxu1 %vm5388_vm0, %v5387_v3  ;;  %v1777_v23 = vpop.permute.xlu0 %1776 }
  0xc8   : > { %5032 = vmatprep.subr.bf16.mxu1 %v5387_v3  ;;  %4125 = vrot.lane.b32.xlu0 %v4116_v31, %s5397_s6  ;;  %v1779_v27 = vpop.permute.xlu1 %1778  ;;  %v1780_v33 = vsel %vm1661_vm5, %v1775_v21, %v1777_v23  ;;  %p5310_p13 = pnand %p5309_p12, %p5456_p4  ;;  %p5317_p3 = por %p5316_p2, %p5315_p1 }
  0xc9   : > { %4792 = vmatmul.mubr.msk.bf16.vlgmr.msra.gmra.mxu0 %vm246_vm3, %v205_v26  ;;  %4127 = vrot.lane.b32.xlu1 %v4124_v37, %s5397_s6  ;;  %v1674_v26 = vsel %vm250_vm1, %v1660_v19, 0  ;;  %v1781_v30 = vsel %vm1661_vm5, %v1777_v23, %v1779_v27  ;;  %v1786_v36 = vsel %vm250_vm1, %v1780_v33, 0 }
  0xca   : > { %1069 = vmatpush1.bf16.msra.mxu0 %v1046_v32  ;;  %1086 = vmatprep.mubr.bf16.mxu0 %v5389_v7  ;;  %v4813_v32 = vld [vmem:[%s6440_s0 + $0x30] sm:$0xf]  ;;  %p5311_p0 = pneg %p5310_p13 }
  0xcb   : > { %4801 = vmatprep.subr.msk.bf16.mxu0 %vm250_vm1, %v1169_v34  ;;  %v1893_v29 = vpop.permute.xlu0 %1892  ;;  %v1792_v34 = vsel %vm250_vm1, %v1779_v27, 0 }
  0xcc   : > { %4129 = vrot.lane.b32.xlu0 %v4123_v42, %s5397_s6  ;;  %v1895_v31 = vpop.permute.xlu1 %1894  ;;  %p5318_p5 = pnand %p5317_p3, %p5311_p0 }
  0xcd   : > { %4244 = vrot.lane.b32.xlu1 %v4235_v43, %s5397_s6 }
  0xce   : > { %5029 = vmatmul.mubr.msk.bf16.vlgmr.msra.gmra.mxu1 %vm246_vm3, %v206_v39 }
  0xcf   : > { %5033 = vmatpush3.bf16.msra.mxu1 %v1180_v41  ;;  %5034 = vmatprep.mubr.msk.bf16.mxu1 %vm5388_vm0, %v5387_v3  ;;  %v1897_v35 = vpop.permute.xlu0 %1896  ;;  %v1898_v41 = vsel %vm1661_vm5, %v1893_v29, %v1895_v31 }
  0xd0   : > { %5038 = vmatprep.subr.bf16.mxu1 %v5387_v3  ;;  %4246 = vrot.lane.b32.xlu0 %v4243_v50, %s5397_s6  ;;  %v2011_v37 = vpop.permute.xlu1 %2010  ;;  %v1899_v38 = vsel %vm1661_vm5, %v1895_v31, %v1897_v35  ;;  %v1910_v42 = vsel %vm250_vm1, %v1897_v35, 0  ;;  %v1904_v44 = vsel %vm250_vm1, %v1898_v41, 0 }
  0xd1   : > { %4795 = vmatmul.mubr.msk.bf16.vlgmr.msra.gmra.mxu0 %vm246_vm3, %v206_v39  ;;  %4248 = vrot.lane.b32.xlu1 %v4242_v52, %s5397_s6 }
  0xd2   : > { %1197 = vmatpush1.bf16.msra.mxu0 %v1174_v47  ;;  %1214 = vmatprep.mubr.bf16.mxu0 %v5389_v7 }
  0xd3   : > { %4804 = vmatprep.subr.msk.bf16.mxu0 %vm250_vm1, %v1287_v49  ;;  %v2013_v39 = vpop.permute.xlu0 %2012 }
  0xd4   : > { %4362 = vrot.lane.b32.xlu0 %v4353_v53, %s5397_s6  ;;  %v2015_v43 = vpop.permute.xlu1 %2014  ;;  %v2016_v49 = vsel %vm1661_vm5, %v2011_v37, %v2013_v39 }
  0xd5   : > { %4364 = vrot.lane.b32.xlu1 %v4361_v59, %s5397_s6  ;;  %v2017_v46 = vsel %vm1661_vm5, %v2013_v39, %v2015_v43  ;;  %v2028_v50 = vsel %vm250_vm1, %v2015_v43, 0  ;;  %v2022_v52 = vsel %vm250_vm1, %v2016_v49, 0 }
  0xd6   : > { %5035 = vmatmul.mubr.msk.bf16.vlgmr.msra.gmra.mxu1 %vm246_vm3, %v4797_v54 }
  0xd7   : > { %5039 = vmatpush3.bf16.msra.mxu1 %v1298_v56  ;;  %5040 = vmatprep.mubr.msk.bf16.mxu1 %vm5388_vm0, %v5387_v3  ;;  %v2150_v45 = vpop.permute.xlu0 %2149  ;;  %v4816_v56 = vld [vmem:[%s6440_s0 + $0x3c] sm:$0xf] }
  0xd8   : > { %5044 = vmatprep.subr.bf16.mxu1 %v5387_v3  ;;  %4366 = vrot.lane.b32.xlu0 %v4360_v0, %s5397_s6  ;;  %v2152_v47 = vpop.permute.xlu1 %2151  ;;  %v4829_v0 = vld [vmem:[%s6440_s0 + $0x40] sm:$0xf] }
  0xd9   : > { %4802 = vmatmul.mubr.msk.bf16.vlgmr.msra.gmra.mxu0 %vm246_vm3, %v4797_v54  ;;  %4480 = vrot.lane.b32.xlu1 %v4471_v1, %s5397_s6  ;;  %v2156_v57 = vsel %vm2155_vm6, %v2150_v45, %v2152_v47 }
  0xda   : > { %1315 = vmatpush1.bf16.msra.mxu0 %v1292_v61  ;;  %1332 = vmatprep.mubr.bf16.mxu0 %v5389_v7  ;;  %v2162_v60 = vsel %vm250_vm1, %v2156_v57, 0 }
  0xdb   : > { %4807 = vmatprep.subr.msk.bf16.mxu0 %vm250_vm1, %v1405_v63  ;;  %v2154_v51 = vpop.permute.xlu0 %2153 }
  0xdc   : > { %4482 = vrot.lane.b32.xlu0 %v4479_v10, %s5397_s6  ;;  %v2269_v53 = vpop.permute.xlu1 %2268  ;;  %v2157_v54 = vsel %vm2155_vm6, %v2152_v47, %v2154_v51  ;;  %v2168_v58 = vsel %vm250_vm1, %v2154_v51, 0 }
  0xdd   : > { %4484 = vrot.lane.b32.xlu1 %v4478_v12, %s5397_s6 }
  0xde   : > { %5041 = vmatmul.mubr.msk.bf16.vlgmr.msra.gmra.mxu1 %vm246_vm3, %v4798_v5 }
  0xdf   : > { %5045 = vmatpush3.bf16.msra.mxu1 %v1416_v9  ;;  %5046 = vmatprep.mubr.msk.bf16.mxu1 %vm5388_vm0, %v5387_v3  ;;  %v2271_v55 = vpop.permute.xlu0 %2270 }
  0xe0   : > { %5050 = vmatprep.subr.bf16.mxu1 %v5387_v3  ;;  %v2273_v59 = vpop.permute.xlu1 %2272  ;;  %v2274_v1 = vsel %vm2155_vm6, %v2269_v53, %v2271_v55 }
  0xe1   : > { %4805 = vmatmul.mubr.msk.bf16.vlgmr.msra.gmra.mxu0 %vm246_vm3, %v4798_v5  ;;  %v2275_v62 = vsel %vm2155_vm6, %v2271_v55, %v2273_v59  ;;  %v2286_v2 = vsel %vm250_vm1, %v2273_v59, 0  ;;  %v2280_v5 = vsel %vm250_vm1, %v2274_v1, 0 }
  0xe2   : > { %1433 = vmatpush1.bf16.msra.mxu0 %v1410_v13  ;;  %1450 = vmatprep.mubr.bf16.mxu0 %v5389_v7 }
  0xe3   : > { %4810 = vmatprep.subr.msk.bf16.mxu0 %vm250_vm1, %v1523_v15  ;;  %v2387_v61 = vpop.permute.xlu0 %2386 }
  0xe4   : > { %v2389_v63 = vpop.permute.xlu1 %2388 }
  0xe5   : > { %v2392_v12 = vsel %vm2155_vm6, %v2387_v61, %v2389_v63 }
  0xe6   : > { %5047 = vmatmul.mubr.msk.bf16.vlgmr.msra.gmra.mxu1 %vm246_vm3, %v4799_v6  ;;  %v2398_v15 = vsel %vm250_vm1, %v2392_v12, 0 }
  0xe7   : > { %5051 = vmatpush3.bf16.msra.mxu1 %v1534_v18  ;;  %5052 = vmatprep.mubr.msk.bf16.mxu1 %vm5388_vm0, %v5387_v3  ;;  %v2391_v4 = vpop.permute.xlu0 %2390  ;;  %v4831_v18 = vld [vmem:[%s6440_s0 + $0x48] sm:$0xf] }
  0xe8   : > { %5056 = vmatprep.subr.bf16.mxu1 %v5387_v3  ;;  %v2505_v8 = vpop.permute.xlu1 %2504  ;;  %v2393_v9 = vsel %vm2155_vm6, %v2389_v63, %v2391_v4  ;;  %v2404_v13 = vsel %vm250_vm1, %v2391_v4, 0 }
  0xe9   : > { %4808 = vmatmul.mubr.msk.bf16.vlgmr.msra.gmra.mxu0 %vm246_vm3, %v4799_v6 }
  0xea   : > { %1551 = vmatpush1.bf16.msra.mxu0 %v1528_v20  ;;  %1568 = vmatprep.mubr.bf16.mxu0 %v5389_v7 }
  0xeb   : > { %4817 = vmatprep.subr.msk.bf16.mxu0 %vm250_vm1, %v1663_v22  ;;  %v2507_v10 = vpop.permute.xlu0 %2506 }
  0xec   : > { %v2509_v14 = vpop.permute.xlu1 %2508  ;;  %v2510_v19 = vsel %vm2155_vm6, %v2505_v8, %v2507_v10 }
  0xed   : > { %v2511_v6 = vsel %vm2155_vm6, %v2507_v10, %v2509_v14  ;;  %v2522_v20 = vsel %vm250_vm1, %v2509_v14, 0  ;;  %v2516_v22 = vsel %vm250_vm1, %v2510_v19, 0 }
  0xee   : > { %5053 = vmatmul.mubr.msk.bf16.vlgmr.msra.gmra.mxu1 %vm246_vm3, %v4800_v24 }
  0xef   : > { %5057 = vmatpush3.bf16.msra.mxu1 %v1674_v26  ;;  %5058 = vmatprep.mubr.msk.bf16.mxu1 %vm5388_vm0, %v5387_v3  ;;  %v2644_v16 = vpop.permute.xlu0 %2643  ;;  %v4832_v26 = vld [vmem:[%s6440_s0 + $0x4c] sm:$0xf] }
  0xf0   : > { %5062 = vmatprep.subr.bf16.mxu1 %v5387_v3  ;;  %v2646_v17 = vpop.permute.xlu1 %2645 }
  0xf1   : > { %4811 = vmatmul.mubr.msk.bf16.vlgmr.msra.gmra.mxu0 %vm246_vm3, %v4800_v24  ;;  %v2650_v27 = vsel %vm2649_vm7, %v2644_v16, %v2646_v17 }
  0xf2   : > { %1691 = vmatpush1.bf16.msra.mxu0 %v1668_v28  ;;  %1708 = vmatprep.mubr.bf16.mxu0 %v5389_v7 }
  0xf3   : > { %4820 = vmatprep.subr.msk.bf16.mxu0 %vm250_vm1, %v1781_v30  ;;  %v2648_v21 = vpop.permute.xlu0 %2647  ;;  %v2656_v30 = vsel %vm250_vm1, %v2650_v27, 0 }
  0xf4   : > { %v2763_v23 = vpop.permute.xlu1 %2762  ;;  %v2651_v24 = vsel %vm2649_vm7, %v2646_v17, %v2648_v21  ;;  %v2662_v28 = vsel %vm250_vm1, %v2648_v21, 0  ;;  %v4862_v17 = vld [vmem:[%s6440_s0 + $0x64] sm:$0xf] }
  0xf6   : > { %5059 = vmatmul.mubr.msk.bf16.vlgmr.msra.gmra.mxu1 %vm246_vm3, %v4813_v32 }
  0xf7   : > { %5063 = vmatpush3.bf16.msra.mxu1 %v1792_v34  ;;  %5064 = vmatprep.mubr.msk.bf16.mxu1 %vm5388_vm0, %v5387_v3  ;;  %v2765_v25 = vpop.permute.xlu0 %2764  ;;  %v4845_v34 = vld [vmem:[%s6440_s0 + $0x50] sm:$0xf] }
  0xf8   : > { %5068 = vmatprep.subr.bf16.mxu1 %v5387_v3  ;;  %v2767_v29 = vpop.permute.xlu1 %2766  ;;  %v2768_v35 = vsel %vm2649_vm7, %v2763_v23, %v2765_v25 }
  0xf9   : > { %4818 = vmatmul.mubr.msk.bf16.vlgmr.msra.gmra.mxu0 %vm246_vm3, %v4813_v32  ;;  %v2769_v32 = vsel %vm2649_vm7, %v2765_v25, %v2767_v29 }
  0xfa   : > { %1809 = vmatpush1.bf16.msra.mxu0 %v1786_v36  ;;  %1826 = vmatprep.mubr.bf16.mxu0 %v5389_v7  ;;  %v2780_v36 = vsel %vm250_vm1, %v2767_v29, 0 }
  0xfb   : > { %4823 = vmatprep.subr.msk.bf16.mxu0 %vm250_vm1, %v1899_v38  ;;  %v2881_v31 = vpop.permute.xlu0 %2880  ;;  %v2774_v38 = vsel %vm250_vm1, %v2768_v35, 0 }
  0xfc   : > { %v2883_v33 = vpop.permute.xlu1 %2882 }
  0xfd   : > { %v2886_v43 = vsel %vm2649_vm7, %v2881_v31, %v2883_v33 }
  0xfe   : > { %5065 = vmatmul.mubr.msk.bf16.vlgmr.msra.gmra.mxu1 %vm246_vm3, %v4814_v40 }
  0xff   : > { %5069 = vmatpush3.bf16.msra.mxu1 %v1910_v42  ;;  %5070 = vmatprep.mubr.msk.bf16.mxu1 %vm5388_vm0, %v5387_v3  ;;  %v2885_v37 = vpop.permute.xlu0 %2884  ;;  %v4846_v42 = vld [vmem:[%s6440_s0 + $0x54] sm:$0xf] }
 0x100   : > { %5074 = vmatprep.subr.bf16.mxu1 %v5387_v3  ;;  %v2999_v39 = vpop.permute.xlu1 %2998 }
 0x101   : > { %4821 = vmatmul.mubr.msk.bf16.vlgmr.msra.gmra.mxu0 %vm246_vm3, %v4814_v40  ;;  %v2887_v40 = vsel %vm2649_vm7, %v2883_v33, %v2885_v37  ;;  %v4863_v33 = vld [vmem:[%s6440_s0 + $0x68] sm:$0xf] }
 0x102   : > { %1927 = vmatpush1.bf16.msra.mxu0 %v1904_v44  ;;  %1944 = vmatprep.mubr.bf16.mxu0 %v5389_v7  ;;  %v2898_v44 = vsel %vm250_vm1, %v2885_v37, 0 }
 0x103   : > { %4826 = vmatprep.subr.msk.bf16.mxu0 %vm250_vm1, %v2017_v46  ;;  %v3001_v41 = vpop.permute.xlu0 %3000  ;;  %v2892_v46 = vsel %vm250_vm1, %v2886_v43, 0 }
 0x104   : > { %v3003_v45 = vpop.permute.xlu1 %3002  ;;  %v3004_v51 = vsel %vm2649_vm7, %v2999_v39, %v3001_v41 }
 0x106   : > { %5071 = vmatmul.mubr.msk.bf16.vlgmr.msra.gmra.mxu1 %vm246_vm3, %v4815_v48 }
 0x107   : > { %5075 = vmatpush3.bf16.msra.mxu1 %v2028_v50  ;;  %5076 = vmatprep.mubr.msk.bf16.mxu1 %vm5388_vm0, %v5387_v3  ;;  %v3138_v47 = vpop.permute.xlu0 %3137  ;;  %v4847_v50 = vld [vmem:[%s6440_s0 + $0x58] sm:$0xf] }
 0x108   : > { %5080 = vmatprep.subr.bf16.mxu1 %v5387_v3 }
 0x109   : > { %4824 = vmatmul.mubr.msk.bf16.vlgmr.msra.gmra.mxu0 %vm246_vm3, %v4815_v48  ;;  %v3005_v48 = vsel %vm2649_vm7, %v3001_v41, %v3003_v45  ;;  %v3140_v49 = vpop.permute.xlu1 %3139 }
 0x10a   : > { %2045 = vmatpush1.bf16.msra.mxu0 %v2022_v52  ;;  %2062 = vmatprep.mubr.bf16.mxu0 %v5389_v7  ;;  %v3016_v52 = vsel %vm250_vm1, %v3003_v45, 0  ;;  %v3144_v59 = vsel %vm3143_vm8, %v3138_v47, %v3140_v49 }
 0x10b   : > { %4833 = vmatprep.subr.msk.bf16.mxu0 %vm250_vm1, %v2157_v54  ;;  %v3142_v53 = vpop.permute.xlu0 %3141  ;;  %v3010_v54 = vsel %vm250_vm1, %v3004_v51, 0 }
 0x10e   : > { %5077 = vmatmul.mubr.msk.bf16.vlgmr.msra.gmra.mxu1 %vm246_vm3, %v4816_v56  ;;  %v3257_v55 = vpop.permute.xlu1 %3256 }
 0x10f   : > { %5081 = vmatpush3.bf16.msra.mxu1 %v2168_v58  ;;  %5082 = vmatprep.mubr.msk.bf16.mxu1 %vm5388_vm0, %v5387_v3  ;;  %v3259_v57 = vpop.permute.xlu0 %3258  ;;  %v4848_v58 = vld [vmem:[%s6440_s0 + $0x5c] sm:$0xf] }
 0x110   : > { %5086 = vmatprep.subr.bf16.mxu1 %v5387_v3  ;;  %v3262_v4 = vsel %vm3143_vm8, %v3257_v55, %v3259_v57 }
 0x111   : > { %4827 = vmatmul.mubr.msk.bf16.vlgmr.msra.gmra.mxu0 %vm246_vm3, %v4816_v56  ;;  %v3145_v56 = vsel %vm3143_vm8, %v3140_v49, %v3142_v53  ;;  %v3268_v10 = vsel %vm250_vm1, %v3262_v4, 0  ;;  %v4864_v49 = vld [vmem:[%s6440_s0 + $0x6c] sm:$0xf] }
 0x112   : > { %2185 = vmatpush1.bf16.msra.mxu0 %v2162_v60  ;;  %2202 = vmatprep.mubr.bf16.mxu0 %v5389_v7  ;;  %v3156_v60 = vsel %vm250_vm1, %v3142_v53, 0  ;;  %v3261_v61 = vpop.permute.xlu1 %3260 }
 0x113   : > { %4836 = vmatprep.subr.msk.bf16.mxu0 %vm250_vm1, %v2275_v62  ;;  %v3150_v62 = vsel %vm250_vm1, %v3144_v59, 0 }
 0x116   : > { %5083 = vmatmul.mubr.msk.bf16.vlgmr.msra.gmra.mxu1 %vm246_vm3, %v4829_v0  ;;  %v3375_v63 = vpop.permute.xlu0 %3374  ;;  %v3377_v1 = vpop.permute.xlu1 %3376 }
 0x117   : > { %5087 = vmatpush3.bf16.msra.mxu1 %v2286_v2  ;;  %5088 = vmatprep.mubr.msk.bf16.mxu1 %vm5388_vm0, %v5387_v3  ;;  %v4861_v2 = vld [vmem:[%s6440_s0 + $0x60] sm:$0xf]  ;;  %v3380_v19 = vsel %vm3143_vm8, %v3375_v63, %v3377_v1 }
 0x118   : > { %5092 = vmatprep.subr.bf16.mxu1 %v5387_v3 }
 0x119   : > { %4834 = vmatmul.mubr.msk.bf16.vlgmr.msra.gmra.mxu0 %vm246_vm3, %v4829_v0  ;;  %v3263_v0 = vsel %vm3143_vm8, %v3259_v57, %v3261_v61 }
 0x11a   : > { %2303 = vmatpush1.bf16.msra.mxu0 %v2280_v5  ;;  %2320 = vmatprep.mubr.bf16.mxu0 %v5389_v7  ;;  %v3274_v5 = vsel %vm250_vm1, %v3261_v61, 0  ;;  %v3379_v8 = vpop.permute.xlu0 %3378 }
 0x11b   : > { %4839 = vmatprep.subr.msk.bf16.mxu0 %vm250_vm1, %v2393_v9 }
 0x11e   : > { %5089 = vmatmul.mubr.msk.bf16.vlgmr.msra.gmra.mxu1 %vm246_vm3, %v4830_v11 }
 0x11f   : > { %5093 = vmatpush3.bf16.msra.mxu1 %v2404_v13  ;;  %5094 = vmatprep.mubr.msk.bf16.mxu1 %vm5388_vm0, %v5387_v3  ;;  %v3381_v13 = vsel %vm3143_vm8, %v3377_v1, %v3379_v8  ;;  %v4877_v1 = vld [vmem:[%s6440_s0 + $0x70] sm:$0xf] }
 0x120   : > { %5098 = vmatprep.subr.bf16.mxu1 %v5387_v3 }
 0x121   : > { %4837 = vmatmul.mubr.msk.bf16.vlgmr.msra.gmra.mxu0 %vm246_vm3, %v4830_v11  ;;  %v3493_v11 = vpop.permute.xlu1 %3492 }
 0x122   : > { %2421 = vmatpush1.bf16.msra.mxu0 %v2398_v15  ;;  %2438 = vmatprep.mubr.bf16.mxu0 %v5389_v7  ;;  %v3495_v15 = vpop.permute.xlu0 %3494 }
 0x123   : > { %4842 = vmatprep.subr.msk.bf16.mxu0 %vm250_vm1, %v2511_v6  ;;  %v3498_v35 = vsel %vm3143_vm8, %v3493_v11, %v3495_v15 }
 0x126   : > { %5095 = vmatmul.mubr.msk.bf16.vlgmr.msra.gmra.mxu1 %vm246_vm3, %v4831_v18 }
 0x127   : > { %5099 = vmatpush3.bf16.msra.mxu1 %v2522_v20  ;;  %5100 = vmatprep.mubr.msk.bf16.mxu1 %vm5388_vm0, %v5387_v3  ;;  %v3392_v20 = vsel %vm250_vm1, %v3379_v8, 0 }
 0x128   : > { %5104 = vmatprep.subr.bf16.mxu1 %v5387_v3 }
 0x129   : > { %4840 = vmatmul.mubr.msk.bf16.vlgmr.msra.gmra.mxu0 %vm246_vm3, %v4831_v18 }
 0x12a   : > { %2539 = vmatpush1.bf16.msra.mxu0 %v2516_v22  ;;  %2556 = vmatprep.mubr.bf16.mxu0 %v5389_v7  ;;  %v3497_v22 = vpop.permute.xlu1 %3496 }
 0x12b   : > { %4849 = vmatprep.subr.msk.bf16.mxu0 %vm250_vm1, %v2651_v24  ;;  %v3386_v24 = vsel %vm250_vm1, %v3380_v19, 0 }
 0x12e   : > { %5101 = vmatmul.mubr.msk.bf16.vlgmr.msra.gmra.mxu1 %vm246_vm3, %v4832_v26 }
 0x12f   : > { %5105 = vmatpush3.bf16.msra.mxu1 %v2662_v28  ;;  %5106 = vmatprep.mubr.msk.bf16.mxu1 %vm5388_vm0, %v5387_v3  ;;  %v3499_v28 = vsel %vm3143_vm8, %v3495_v15, %v3497_v22 }
 0x130   : > { %5110 = vmatprep.subr.bf16.mxu1 %v5387_v3 }
 0x131   : > { %4843 = vmatmul.mubr.msk.bf16.vlgmr.msra.gmra.mxu0 %vm246_vm3, %v4832_v26  ;;  %v3632_v26 = vpop.permute.xlu0 %3631 }
 0x132   : > { %2679 = vmatpush1.bf16.msra.mxu0 %v2656_v30  ;;  %2696 = vmatprep.mubr.bf16.mxu0 %v5389_v7  ;;  %v3634_v30 = vpop.permute.xlu1 %3633 }
 0x133   : > { %4852 = vmatprep.subr.msk.bf16.mxu0 %vm250_vm1, %v2769_v32  ;;  %v3638_v51 = vsel %vm3637_vm9, %v3632_v26, %v3634_v30 }
 0x136   : > { %5107 = vmatmul.mubr.msk.bf16.vlgmr.msra.gmra.mxu1 %vm246_vm3, %v4845_v34 }
 0x137   : > { %5111 = vmatpush3.bf16.msra.mxu1 %v2780_v36  ;;  %5112 = vmatprep.mubr.msk.bf16.mxu1 %vm5388_vm0, %v5387_v3  ;;  %v3510_v36 = vsel %vm250_vm1, %v3497_v22, 0 }
 0x138   : > { %5116 = vmatprep.subr.bf16.mxu1 %v5387_v3 }
 0x139   : > { %4850 = vmatmul.mubr.msk.bf16.vlgmr.msra.gmra.mxu0 %vm246_vm3, %v4845_v34 }
 0x13a   : > { %2797 = vmatpush1.bf16.msra.mxu0 %v2774_v38  ;;  %2814 = vmatprep.mubr.bf16.mxu0 %v5389_v7  ;;  %v3636_v38 = vpop.permute.xlu0 %3635 }
 0x13b   : > { %4855 = vmatprep.subr.msk.bf16.mxu0 %vm250_vm1, %v2887_v40  ;;  %v3504_v40 = vsel %vm250_vm1, %v3498_v35, 0 }
 0x13e   : > { %5113 = vmatmul.mubr.msk.bf16.vlgmr.msra.gmra.mxu1 %vm246_vm3, %v4846_v42 }
 0x13f   : > { %5117 = vmatpush3.bf16.msra.mxu1 %v2898_v44  ;;  %5118 = vmatprep.mubr.msk.bf16.mxu1 %vm5388_vm0, %v5387_v3  ;;  %v3639_v44 = vsel %vm3637_vm9, %v3634_v30, %v3636_v38 }
 0x140   : > { %5122 = vmatprep.subr.bf16.mxu1 %v5387_v3 }
 0x141   : > { %4853 = vmatmul.mubr.msk.bf16.vlgmr.msra.gmra.mxu0 %vm246_vm3, %v4846_v42  ;;  %v3751_v42 = vpop.permute.xlu1 %3750 }
 0x142   : > { %2915 = vmatpush1.bf16.msra.mxu0 %v2892_v46  ;;  %2932 = vmatprep.mubr.bf16.mxu0 %v5389_v7  ;;  %v3753_v46 = vpop.permute.xlu0 %3752 }
 0x143   : > { %4858 = vmatprep.subr.msk.bf16.mxu0 %vm250_vm1, %v3005_v48  ;;  %v3756_v4 = vsel %vm3637_vm9, %v3751_v42, %v3753_v46 }
 0x146   : > { %5119 = vmatmul.mubr.msk.bf16.vlgmr.msra.gmra.mxu1 %vm246_vm3, %v4847_v50 }
 0x147   : > { %5123 = vmatpush3.bf16.msra.mxu1 %v3016_v52  ;;  %5124 = vmatprep.mubr.msk.bf16.mxu1 %vm5388_vm0, %v5387_v3  ;;  %v3650_v52 = vsel %vm250_vm1, %v3636_v38, 0 }
 0x148   : > { %5128 = vmatprep.subr.bf16.mxu1 %v5387_v3 }
 0x149   : > { %4856 = vmatmul.mubr.msk.bf16.vlgmr.msra.gmra.mxu0 %vm246_vm3, %v4847_v50 }
 0x14a   : > { %3033 = vmatpush1.bf16.msra.mxu0 %v3010_v54  ;;  %3050 = vmatprep.mubr.bf16.mxu0 %v5389_v7  ;;  %v3755_v54 = vpop.permute.xlu1 %3754 }
 0x14b   : > { %4865 = vmatprep.subr.msk.bf16.mxu0 %vm250_vm1, %v3145_v56  ;;  %v3644_v56 = vsel %vm250_vm1, %v3638_v51, 0 }
 0x14e   : > { %5125 = vmatmul.mubr.msk.bf16.vlgmr.msra.gmra.mxu1 %vm246_vm3, %v4848_v58 }
 0x14f   : > { %5129 = vmatpush3.bf16.msra.mxu1 %v3156_v60  ;;  %5130 = vmatprep.mubr.msk.bf16.mxu1 %vm5388_vm0, %v5387_v3  ;;  %v3757_v60 = vsel %vm3637_vm9, %v3753_v46, %v3755_v54 }
 0x150   : > { %5134 = vmatprep.subr.bf16.mxu1 %v5387_v3 }
 0x151   : > { %4859 = vmatmul.mubr.msk.bf16.vlgmr.msra.gmra.mxu0 %vm246_vm3, %v4848_v58  ;;  %v3869_v58 = vpop.permute.xlu0 %3868 }
 0x152   : > { %3173 = vmatpush1.bf16.msra.mxu0 %v3150_v62  ;;  %3190 = vmatprep.mubr.bf16.mxu0 %v5389_v7  ;;  %v3871_v62 = vpop.permute.xlu1 %3870 }
 0x153   : > { %4868 = vmatprep.subr.msk.bf16.mxu0 %vm250_vm1, %v3263_v0 }
 0x156   : > { %v6029_v9 = vpop.f32.mrf.mxu1  ;;  %5131 = vmatmul.mubr.msk.bf16.vlgmr.msra.gmra.mxu1 %vm246_vm3, %v4861_v2 }
 0x157   : > { %5135 = vmatpush3.bf16.msra.mxu1 %v3274_v5  ;;  %5136 = vmatprep.mubr.msk.bf16.mxu1 %vm5388_vm0, %v5387_v3  ;;  %v3768_v5 = vsel %vm250_vm1, %v3755_v54, 0 }
 0x158   : > { %v4988_v12 = vpop.f32.mrf.mxu1  ;;  %5140 = vmatprep.subr.bf16.mxu1 %v5387_v3 }
 0x159   : > { %v6037_v14 = vpop.f32.mrf.mxu0  ;;  %4866 = vmatmul.mubr.msk.bf16.vlgmr.msra.gmra.mxu0 %vm246_vm3, %v4861_v2  ;;  %v3762_v12 = vsel %vm250_vm1, %v3756_v4, 0 }
 0x15a   : > { %3291 = vmatpush1.bf16.msra.mxu0 %v3268_v10  ;;  %v338_v16 = vpop.f32.mrf.mxu1  ;;  %3308 = vmatprep.mubr.bf16.mxu0 %v5389_v7  ;;  %v3873_v10 = vpop.permute.xlu0 %3872 }
 0x15b   : > { %v6041_v6 = vpop.f32.mrf.mxu0  ;;  %4871 = vmatprep.subr.msk.bf16.mxu0 %vm250_vm1, %v3381_v13  ;;  %v3987_v16 = vpop.permute.xlu1 %3986 }
 0x15c   : > { %v4989_v18 = vpop.f32.mrf.mxu1 }
 0x15d   : > { %v298_v21 = vpop.f32.mrf.mxu0  ;;  %v3875_v18 = vsel %vm3637_vm9, %v3871_v62, %v3873_v10 }
 0x15e   : > { %v6049_v23 = vpop.f32.mrf.mxu1  ;;  %5137 = vmatmul.mubr.msk.bf16.vlgmr.msra.gmra.mxu1 %vm246_vm3, %v4862_v17 }
 0x15f   : > { %v299_v25 = vpop.f32.mrf.mxu0  ;;  %5141 = vmatpush3.bf16.msra.mxu1 %v3392_v20  ;;  %5142 = vmatprep.mubr.msk.bf16.mxu1 %vm5388_vm0, %v5387_v3  ;;  %v3989_v20 = vpop.permute.xlu0 %3988 }
 0x160   : > { %v4994_v27 = vpop.f32.mrf.mxu1  ;;  %5146 = vmatprep.subr.bf16.mxu1 %v5387_v3  ;;  %v3991_v30 = vpop.permute.xlu1 %3990 }
 0x161   : > { %v6057_v29 = vpop.f32.mrf.mxu0  ;;  %4869 = vmatmul.mubr.msk.bf16.vlgmr.msra.gmra.mxu0 %vm246_vm3, %v4862_v17  ;;  %v3874_v27 = vsel %vm3637_vm9, %v3869_v58, %v3871_v62 }
 0x162   : > { %3409 = vmatpush1.bf16.msra.mxu0 %v3386_v24  ;;  %v456_v31 = vpop.f32.mrf.mxu1  ;;  %3426 = vmatprep.mubr.bf16.mxu0 %v5389_v7  ;;  %v4878_v24 = vld [vmem:[%s6440_s0 + $0x74] sm:$0xf] }
 0x163   : > { %v6061_v32 = vpop.f32.mrf.mxu0  ;;  %4874 = vmatprep.subr.msk.bf16.mxu0 %vm250_vm1, %v3499_v28 }
 0x164   : > { %v4995_v34 = vpop.f32.mrf.mxu1 }
 0x165   : > { %v416_v37 = vpop.f32.mrf.mxu0 }
 0x166   : > { %v6069_v39 = vpop.f32.mrf.mxu1  ;;  %5143 = vmatmul.mubr.msk.bf16.vlgmr.msra.gmra.mxu1 %vm246_vm3, %v4863_v33  ;;  %v3993_v37 = vsel %vm3637_vm9, %v3989_v20, %v3991_v30 }
 0x167   : > { %v417_v41 = vpop.f32.mrf.mxu0  ;;  %5147 = vmatpush3.bf16.msra.mxu1 %v3510_v36  ;;  %5148 = vmatprep.mubr.msk.bf16.mxu1 %vm5388_vm0, %v5387_v3 }
 0x168   : > { %v5000_v43 = vpop.f32.mrf.mxu1  ;;  %5152 = vmatprep.subr.bf16.mxu1 %v5387_v3 }
 0x169   : > { %v6077_v45 = vpop.f32.mrf.mxu0  ;;  %4872 = vmatmul.mubr.msk.bf16.vlgmr.msra.gmra.mxu0 %vm246_vm3, %v4863_v33  ;;  %v3880_v33 = vsel %vm250_vm1, %v3874_v27, 0  ;;  %v4879_v43 = vld [vmem:[%s6440_s0 + $0x78] sm:$0xf] }
 0x16a   : > { %3527 = vmatpush1.bf16.msra.mxu0 %v3504_v40  ;;  %v574_v47 = vpop.f32.mrf.mxu1  ;;  %3544 = vmatprep.mubr.bf16.mxu0 %v5389_v7  ;;  %v4128_v40 = vpop.permute.xlu1 %4127 }
 0x16b   : > { %v6081_v48 = vpop.f32.mrf.mxu0  ;;  %4881 = vmatprep.subr.msk.bf16.mxu0 %vm250_vm1, %v3639_v44  ;;  %v3992_v47 = vsel %vm3637_vm9, %v3987_v16, %v3989_v20 }
 0x16c   : > { %v5001_v50 = vpop.f32.mrf.mxu1 }
 0x16d   : > { %v534_v53 = vpop.f32.mrf.mxu0 }
 0x16e   : > { %v6089_v55 = vpop.f32.mrf.mxu1  ;;  %5149 = vmatmul.mubr.msk.bf16.vlgmr.msra.gmra.mxu1 %vm246_vm3, %v4864_v49 }
 0x16f   : > { %v535_v57 = vpop.f32.mrf.mxu0  ;;  %5153 = vmatpush3.bf16.msra.mxu1 %v3650_v52  ;;  %5154 = vmatprep.mubr.msk.bf16.mxu1 %vm5388_vm0, %v5387_v3  ;;  %v3998_v52 = vsel %vm250_vm1, %v3992_v47, 0 }
 0x170   : > { %v5006_v59 = vpop.f32.mrf.mxu1  ;;  %5158 = vmatprep.subr.bf16.mxu1 %v5387_v3 }
 0x171   : > { %v6097_v61 = vpop.f32.mrf.mxu0  ;;  %4875 = vmatmul.mubr.msk.bf16.vlgmr.msra.gmra.mxu0 %vm246_vm3, %v4864_v49 }
 0x172   : > { %3667 = vmatpush1.bf16.msra.mxu0 %v3644_v56  ;;  %v692_v63 = vpop.f32.mrf.mxu1  ;;  %3684 = vmatprep.mubr.bf16.mxu0 %v5389_v7 }
 0x173   : > { %v6101_v0 = vpop.f32.mrf.mxu0  ;;  %4884 = vmatprep.subr.msk.bf16.mxu0 %vm250_vm1, %v3757_v60  ;;  %v4880_v63 = vld [vmem:[%s6440_s0 + $0x7c] sm:$0xf] }
 0x174   : > { %v5007_v2 = vpop.f32.mrf.mxu1 }
 0x175   : > { %v652_v8 = vpop.f32.mrf.mxu0 }
 0x176   : > { %v799_v11 = vpop.f32.mrf.mxu1  ;;  %5155 = vmatmul.mubr.msk.bf16.vlgmr.msra.gmra.mxu1 %vm246_vm3, %v4877_v1 }
 0x177   : > { %v6112_v13 = vadd.f32 %v799_v11, %v6029_v9  ;;  %v653_v15 = vpop.f32.mrf.mxu0  ;;  %5159 = vmatpush3.bf16.msra.mxu1 %v3768_v5  ;;  %5160 = vmatprep.mubr.msk.bf16.mxu1 %vm5388_vm0, %v5387_v3 }
 0x178   : > { %v5012_v17 = vpop.f32.mrf.mxu1  ;;  %5164 = vmatprep.subr.bf16.mxu1 %v5387_v3 }
 0x179   : > { %v758_v19 = vpop.f32.mrf.mxu0  ;;  %4882 = vmatmul.mubr.msk.bf16.vlgmr.msra.gmra.mxu0 %vm246_vm3, %v4877_v1 }
 0x17a   : > { %v6120_v21 = vadd.f32 %v758_v19, %v6037_v14  ;;  %3785 = vmatpush1.bf16.msra.mxu0 %v3762_v12  ;;  %v802_v9 = vpop.f32.mrf.mxu1  ;;  %3802 = vmatprep.mubr.bf16.mxu0 %v5389_v7  ;;  %v3886_v14 = vsel %vm250_vm1, %v3873_v10, 0 }
 0x17b   : > { %v760_v22 = vpop.f32.mrf.mxu0  ;;  %4887 = vmatprep.subr.msk.bf16.mxu0 %vm250_vm1, %v3875_v18 }
 0x17c   : > { %v6128_v25 = vadd.f32 %v760_v22, %v6041_v6  ;;  %v5013_v26 = vpop.f32.mrf.mxu1  ;;  %v4126_v6 = vpop.permute.xlu0 %4125  ;;  %v4893_v22 = vld [vmem:[%s6440_s0 + $0x80] sm:$0xf] }
 0x17d   : > { %v762_v28 = vpop.f32.mrf.mxu0  ;;  %v4132_v4 = vsel %vm4131_vm10, %v4126_v6, %v4128_v40 }
 0x17e   : > { %v909_v31 = vpop.f32.mrf.mxu1  ;;  %5161 = vmatmul.mubr.msk.bf16.vlgmr.msra.gmra.mxu1 %vm246_vm3, %v4878_v24  ;;  %v4138_v11 = vsel %vm250_vm1, %v4132_v4, 0 }
 0x17f   : > { %v6135_v34 = vadd.f32 %v909_v31, %v6049_v23  ;;  %v763_v35 = vpop.f32.mrf.mxu0  ;;  %5165 = vmatpush3.bf16.msra.mxu1 %v3886_v14  ;;  %5166 = vmatprep.mubr.msk.bf16.mxu1 %vm5388_vm0, %v5387_v3 }
 0x180   : > { %v5018_v36 = vpop.f32.mrf.mxu1  ;;  %5170 = vmatprep.subr.bf16.mxu1 %v5387_v3  ;;  %v4130_v50 = vpop.permute.xlu0 %4129 }
 0x181   : > { %v868_v38 = vpop.f32.mrf.mxu0  ;;  %4885 = vmatmul.mubr.msk.bf16.vlgmr.msra.gmra.mxu0 %vm246_vm3, %v4878_v24  ;;  %v4133_v57 = vsel %vm4131_vm10, %v4128_v40, %v4130_v50 }
 0x182   : > { %v6143_v41 = vadd.f32 %v868_v38, %v6057_v29  ;;  %3903 = vmatpush1.bf16.msra.mxu0 %v3880_v33  ;;  %v912_v23 = vpop.f32.mrf.mxu1  ;;  %3920 = vmatprep.mubr.bf16.mxu0 %v5389_v7  ;;  %v4004_v29 = vsel %vm250_vm1, %v3991_v30, 0 }
 0x183   : > { %v870_v42 = vpop.f32.mrf.mxu0  ;;  %4890 = vmatprep.subr.msk.bf16.mxu0 %vm250_vm1, %v3993_v37  ;;  %v4894_v23 = vld [vmem:[%s6440_s0 + $0x84] sm:$0xf] }
 0x184   : > { %v6151_v44 = vadd.f32 %v870_v42, %v6061_v32  ;;  %v5019_v46 = vpop.f32.mrf.mxu1  ;;  %v4245_v32 = vpop.permute.xlu1 %4244 }
 0x185   : > { %v872_v49 = vpop.f32.mrf.mxu0  ;;  %v4247_v59 = vpop.permute.xlu0 %4246 }
 0x186   : > { %v1019_v51 = vpop.f32.mrf.mxu1  ;;  %5167 = vmatmul.mubr.msk.bf16.vlgmr.msra.gmra.mxu1 %vm246_vm3, %v4879_v43  ;;  %v4250_v27 = vsel %vm4131_vm10, %v4245_v32, %v4247_v59 }
 0x187   : > { %v6158_v53 = vadd.f32 %v1019_v51, %v6069_v39  ;;  %v873_v54 = vpop.f32.mrf.mxu0  ;;  %5171 = vmatpush3.bf16.msra.mxu1 %v4004_v29  ;;  %5172 = vmatprep.mubr.msk.bf16.mxu1 %vm5388_vm0, %v5387_v3  ;;  %v4256_v31 = vsel %vm250_vm1, %v4250_v27, 0 }
 0x188   : > { %v5024_v56 = vpop.f32.mrf.mxu1  ;;  %5176 = vmatprep.subr.bf16.mxu1 %v5387_v3  ;;  %v4249_v8 = vpop.permute.xlu1 %4248 }
 0x189   : > { %v978_v58 = vpop.f32.mrf.mxu0  ;;  %4888 = vmatmul.mubr.msk.bf16.vlgmr.msra.gmra.mxu0 %vm246_vm3, %v4879_v43  ;;  %v4251_v17 = vsel %vm4131_vm10, %v4247_v59, %v4249_v8  ;;  %v4895_v59 = vld [vmem:[%s6440_s0 + $0x88] sm:$0xf] }
 0x18a   : > { %v6166_v60 = vadd.f32 %v978_v58, %v6077_v45  ;;  %4021 = vmatpush1.bf16.msra.mxu0 %v3998_v52  ;;  %v1022_v39 = vpop.f32.mrf.mxu1  ;;  %4038 = vmatprep.mubr.bf16.mxu0 %v5389_v7  ;;  %v4144_v45 = vsel %vm250_vm1, %v4130_v50, 0 }
 0x18b   : > { %v980_v62 = vpop.f32.mrf.mxu0  ;;  %4897 = vmatprep.subr.msk.bf16.mxu0 %vm250_vm1, %v4133_v57 }
 0x18c   : > { %v6174_v1 = vadd.f32 %v980_v62, %v6081_v48  ;;  %v5025_v2 = vpop.f32.mrf.mxu1  ;;  %v4363_v48 = vpop.permute.xlu0 %4362 }
 0x18d   : > { %v982_v5 = vpop.f32.mrf.mxu0  ;;  %v4365_v19 = vpop.permute.xlu1 %4364 }
 0x18e   : > { %v1129_v10 = vpop.f32.mrf.mxu1  ;;  %5173 = vmatmul.mubr.msk.bf16.vlgmr.msra.gmra.mxu1 %vm246_vm3, %v4880_v63  ;;  %v4368_v46 = vsel %vm4131_vm10, %v4363_v48, %v4365_v19 }
 0x18f   : > { %v6181_v12 = vadd.f32 %v1129_v10, %v6089_v55  ;;  %v983_v15 = vpop.f32.mrf.mxu0  ;;  %5177 = vmatpush3.bf16.msra.mxu1 %v4144_v45  ;;  %5178 = vmatprep.mubr.msk.bf16.mxu1 %vm5388_vm0, %v5387_v3  ;;  %v4374_v51 = vsel %vm250_vm1, %v4368_v46, 0 }
 0x190   : > { %v5030_v16 = vpop.f32.mrf.mxu1  ;;  %5182 = vmatprep.subr.bf16.mxu1 %v5387_v3  ;;  %v4367_v28 = vpop.permute.xlu0 %4366 }
 0x191   : > { %v1088_v18 = vpop.f32.mrf.mxu0  ;;  %4891 = vmatmul.mubr.msk.bf16.vlgmr.msra.gmra.mxu0 %vm246_vm3, %v4880_v63  ;;  %v4369_v36 = vsel %vm4131_vm10, %v4365_v19, %v4367_v28 }
 0x192   : > { %v6189_v20 = vadd.f32 %v1088_v18, %v6097_v61  ;;  %4161 = vmatpush1.bf16.msra.mxu0 %v4138_v11  ;;  %v1132_v55 = vpop.f32.mrf.mxu1  ;;  %4178 = vmatprep.mubr.bf16.mxu0 %v5389_v7  ;;  %v4262_v61 = vsel %vm250_vm1, %v4249_v8, 0 }
 0x193   : > { %v1090_v9 = vpop.f32.mrf.mxu0  ;;  %4900 = vmatprep.subr.msk.bf16.mxu0 %vm250_vm1, %v4251_v17 }
 0x194   : > { %v6197_v24 = vadd.f32 %v1090_v9, %v6101_v0  ;;  %v5031_v26 = vpop.f32.mrf.mxu1  ;;  %v4481_v0 = vpop.permute.xlu1 %4480 }
 0x195   : > { %v1092_v14 = vpop.f32.mrf.mxu0  ;;  %v4483_v47 = vpop.permute.xlu0 %4482 }
 0x196   : > { %v1257_v30 = vpop.f32.mrf.mxu1  ;;  %5179 = vmatmul.mubr.msk.bf16.vlgmr.msra.gmra.mxu1 %vm246_vm3, %v4893_v22  ;;  %v4486_v63 = vsel %vm4131_vm10, %v4481_v0, %v4483_v47 }
 0x197   : > { %v6204_v33 = vadd.f32 %v1257_v30, %v6112_v13  ;;  %v1093_v35 = vpop.f32.mrf.mxu0  ;;  %5183 = vmatpush3.bf16.msra.mxu1 %v4262_v61  ;;  %5184 = vmatprep.mubr.msk.bf16.mxu1 %vm5388_vm0, %v5387_v3  ;;  %v4492_v45 = vsel %vm250_vm1, %v4486_v63, 0 }
 0x198   : > { %v5036_v6 = vpop.f32.mrf.mxu1  ;;  %5188 = vmatprep.subr.bf16.mxu1 %v5387_v3  ;;  %v4485_v49 = vpop.permute.xlu1 %4484 }
 0x199   : > { %v1216_v37 = vpop.f32.mrf.mxu0  ;;  %4898 = vmatmul.mubr.msk.bf16.vlgmr.msra.gmra.mxu0 %vm246_vm3, %v4893_v22  ;;  %v4487_v32 = vsel %vm4131_vm10, %v4483_v47, %v4485_v49  ;;  %v4498_v2 = vsel %vm250_vm1, %v4485_v49, 0 }
 0x19a   : > { %v6212_v38 = vadd.f32 %v1216_v37, %v6120_v21  ;;  %4279 = vmatpush1.bf16.msra.mxu0 %v4256_v31  ;;  %v1260_v13 = vpop.f32.mrf.mxu1  ;;  %4296 = vmatprep.mubr.bf16.mxu0 %v5389_v7  ;;  %v4380_v21 = vsel %vm250_vm1, %v4367_v28, 0 }
 0x19b   : > { %v1218_v40 = vpop.f32.mrf.mxu0  ;;  %4903 = vmatprep.subr.msk.bf16.mxu0 %vm250_vm1, %v4369_v36 }
 0x19c   : > { %v6220_v42 = vadd.f32 %v1218_v40, %v6128_v25  ;;  %v5037_v43 = vpop.f32.mrf.mxu1 }
 0x19d   : > { %v1220_v29 = vpop.f32.mrf.mxu0 }
 0x19e   : > { %v1375_v50 = vpop.f32.mrf.mxu1  ;;  %5185 = vmatmul.mubr.msk.bf16.vlgmr.msra.gmra.mxu1 %vm246_vm3, %v4894_v23 }
 0x19f   : > { %v6227_v52 = vadd.f32 %v1375_v50, %v6135_v34  ;;  %v1221_v54 = vpop.f32.mrf.mxu0  ;;  %5189 = vmatpush3.bf16.msra.mxu1 %v4380_v21  ;;  %5190 = vmatprep.mubr.msk.bf16.mxu1 %vm5388_vm0, %v5387_v3 }
 0x1a0   : > { %v5042_v25 = vpop.f32.mrf.mxu1  ;;  %5194 = vmatprep.subr.bf16.mxu1 %v5387_v3 }
 0x1a1   : > { %v1334_v56 = vpop.f32.mrf.mxu0  ;;  %4901 = vmatmul.mubr.msk.bf16.vlgmr.msra.gmra.mxu0 %vm246_vm3, %v4894_v23 }
 0x1a2   : > { %v1620_v57 = vadd.f32 %v1334_v56, %v6143_v41  ;;  %4397 = vmatpush1.bf16.msra.mxu0 %v4374_v51  ;;  %v1378_v58 = vpop.f32.mrf.mxu1  ;;  %4414 = vmatprep.mubr.bf16.mxu0 %v5389_v7 }
 0x1a3   : > { %v1336_v34 = vpop.f32.mrf.mxu0  ;;  %4906 = vmatprep.subr.msk.bf16.mxu0 %vm250_vm1, %v4487_v32 }
 0x1a4   : > { %v1621_v39 = vadd.f32 %v1336_v34, %v6151_v44  ;;  %v5043_v62 = vpop.f32.mrf.mxu1 }
 0x1a5   : > { %v1338_v4 = vpop.f32.mrf.mxu0 }
 0x1a6   : > { %v1493_v41 = vpop.f32.mrf.mxu1  ;;  %5191 = vmatmul.mubr.msk.bf16.vlgmr.msra.gmra.mxu1 %vm246_vm3, %v4895_v59 }
 0x1a7   : > { %v1625_v5 = vadd.f32 %v1493_v41, %v6158_v53  ;;  %v1339_v8 = vpop.f32.mrf.mxu0  ;;  %5195 = vmatpush3.bf16.msra.mxu1 %v4498_v2  ;;  %5196 = vmatprep.mubr.msk.bf16.mxu1 %vm5388_vm0, %v5387_v3  ;;  %v4896_v53 = vld [vmem:[%s6440_s0 + $0x8c] sm:$0xf] }
 0x1a8   : > { %v5048_v10 = vpop.f32.mrf.mxu1 }
 0x1a9   : > { %v1452_v44 = vpop.f32.mrf.mxu0  ;;  %4904 = vmatmul.mubr.msk.bf16.vlgmr.msra.gmra.mxu0 %vm246_vm3, %v4895_v59 }
 0x1aa   : > { %v1623_v11 = vadd.f32 %v1452_v44, %v6166_v60  ;;  %4515 = vmatpush1.bf16.msra.mxu0 %v4492_v45  ;;  %v1496_v15 = vpop.f32.mrf.mxu1  ;;  %4532 = vmatprep.mubr.bf16.mxu0 %v5389_v7 }
 0x1ab   : > { %v1454_v48 = vpop.f32.mrf.mxu0 }
 0x1ac   : > { %v1624_v16 = vadd.f32 %v1454_v48, %v6174_v1  ;;  %v5049_v17 = vpop.f32.mrf.mxu1 }
 0x1ad   : > { %v1456_v18 = vpop.f32.mrf.mxu0 }
 0x1ae   : > { %v1611_v19 = vpop.f32.mrf.mxu1  ;;  %5197 = vmatmul.mubr.msk.bf16.vlgmr.msra.gmra.mxu1 %vm246_vm3, %v4896_v53 }
 0x1af   : > { %v1628_v55 = vadd.f32 %v1611_v19, %v6181_v12  ;;  %v1457_v9 = vpop.f32.mrf.mxu0 }
 0x1b0   : > { %v5054_v60 = vpop.f32.mrf.mxu1 }
 0x1b1   : > { %v1570_v22 = vpop.f32.mrf.mxu0  ;;  %4907 = vmatmul.mubr.msk.bf16.vlgmr.msra.gmra.mxu0 %vm246_vm3, %v4896_v53 }
 0x1b2   : > { %v1626_v7 = vadd.f32 %v1570_v22, %v6189_v20  ;;  %v1614_v26 = vpop.f32.mrf.mxu1 }
 0x1b3   : > { %v1572_v27 = vpop.f32.mrf.mxu0 }
 0x1b4   : > { %v1627_v61 = vadd.f32 %v1572_v27, %v6197_v24  ;;  %v5055_v14 = vpop.f32.mrf.mxu1 }
 0x1b5   : > { %v1574_v1 = vpop.f32.mrf.mxu0 }
 0x1b6   : > { %v1751_v28 = vpop.f32.mrf.mxu1 }
 0x1b7   : > { %v2113_v30 = vadd.f32 %v1751_v28, %v6204_v33  ;;  %v1575_v31 = vpop.f32.mrf.mxu0 }
 0x1b8   : > { %v5060_v35 = vpop.f32.mrf.mxu1 }
 0x1b9   : > { %v1710_v0 = vpop.f32.mrf.mxu0 }
 0x1ba   : > { %v2111_v12 = vadd.f32 %v1710_v0, %v6212_v38  ;;  %v1754_v6 = vpop.f32.mrf.mxu1 }
 0x1bb   : > { %v1712_v36 = vpop.f32.mrf.mxu0 }
 0x1bc   : > { %v2112_v37 = vadd.f32 %v1712_v36, %v6220_v42  ;;  %v5061_v13 = vpop.f32.mrf.mxu1 }
 0x1bd   : > { %v1714_v20 = vpop.f32.mrf.mxu0 }
 0x1be   : > { %v1869_v40 = vpop.f32.mrf.mxu1 }
 0x1bf   : > { %v2116_v23 = vadd.f32 %v1869_v40, %v6227_v52  ;;  %v1715_v24 = vpop.f32.mrf.mxu0 }
 0x1c0   : > { %v5066_v43 = vpop.f32.mrf.mxu1 }
 0x1c1   : > { %v1828_v46 = vpop.f32.mrf.mxu0 }
 0x1c2   : > { %v2114_v21 = vadd.f32 %v1828_v46, %v1620_v57  ;;  %v1872_v47 = vpop.f32.mrf.mxu1 }
 0x1c3   : > { %v1830_v33 = vpop.f32.mrf.mxu0 }
 0x1c4   : > { %v2115_v29 = vadd.f32 %v1830_v33, %v1621_v39  ;;  %v5067_v49 = vpop.f32.mrf.mxu1 }
 0x1c5   : > { %v1832_v50 = vpop.f32.mrf.mxu0 }
 0x1c6   : > { %v1987_v51 = vpop.f32.mrf.mxu1 }
 0x1c7   : > { %v2119_v38 = vadd.f32 %v1987_v51, %v1625_v5  ;;  %v1833_v54 = vpop.f32.mrf.mxu0 }
 0x1c8   : > { %v5072_v25 = vpop.f32.mrf.mxu1 }
 0x1c9   : > { %v1946_v32 = vpop.f32.mrf.mxu0 }
 0x1ca   : > { %v2117_v42 = vadd.f32 %v1946_v32, %v1623_v11  ;;  %v1990_v56 = vpop.f32.mrf.mxu1 }
 0x1cb   : > { %v1948_v58 = vpop.f32.mrf.mxu0 }
 0x1cc   : > { %v2118_v34 = vadd.f32 %v1948_v58, %v1624_v16  ;;  %v5073_v59 = vpop.f32.mrf.mxu1 }
 0x1cd   : > { %v1950_v52 = vpop.f32.mrf.mxu0 }
 0x1ce   : > { %v2105_v62 = vpop.f32.mrf.mxu1 }
 0x1cf   : > { %v2122_v63 = vadd.f32 %v2105_v62, %v1628_v55  ;;  %v1951_v2 = vpop.f32.mrf.mxu0 }
 0x1d0   : > { %v5078_v57 = vpop.f32.mrf.mxu1 }
 0x1d1   : > { %v2064_v4 = vpop.f32.mrf.mxu0 }
 0x1d2   : > { %v2120_v39 = vadd.f32 %v2064_v4, %v1626_v7  ;;  %v2108_v41 = vpop.f32.mrf.mxu1 }
 0x1d3   : > { %v2066_v45 = vpop.f32.mrf.mxu0 }
 0x1d4   : > { %v2121_v5 = vadd.f32 %v2066_v45, %v1627_v61  ;;  %v5079_v8 = vpop.f32.mrf.mxu1 }
 0x1d5   : > { %v2068_v10 = vpop.f32.mrf.mxu0 }
 0x1d6   : > { %v2245_v44 = vpop.f32.mrf.mxu1 }
 0x1d7   : > { %v2607_v11 = vadd.f32 %v2245_v44, %v2113_v30  ;;  %v2069_v15 = vpop.f32.mrf.mxu0 }
 0x1d8   : > { %v5084_v48 = vpop.f32.mrf.mxu1 }
 0x1d9   : > { %v2204_v53 = vpop.f32.mrf.mxu0 }
 0x1da   : > { %v2605_v16 = vadd.f32 %v2204_v53, %v2111_v12  ;;  %v2248_v17 = vpop.f32.mrf.mxu1 }
 0x1db   : > { %v2206_v18 = vpop.f32.mrf.mxu0 }
 0x1dc   : > { %v2606_v19 = vadd.f32 %v2206_v18, %v2112_v37  ;;  %v5085_v55 = vpop.f32.mrf.mxu1 }
 0x1dd   : > { %v2208_v9 = vpop.f32.mrf.mxu0 }
 0x1de   : > { %v2363_v60 = vpop.f32.mrf.mxu1 }
 0x1df   : > { %v2610_v22 = vadd.f32 %v2363_v60, %v2116_v23  ;;  %v2209_v7 = vpop.f32.mrf.mxu0 }
 0x1e0   : > { %v5090_v26 = vpop.f32.mrf.mxu1 }
 0x1e1   : > { %v2322_v3 = vpop.f32.mrf.mxu0 }
 0x1e2   : > { %v2608_v27 = vadd.f32 %v2322_v3, %v2114_v21  ;;  %v2366_v61 = vpop.f32.mrf.mxu1 }
 0x1e3   : > { %v2324_v14 = vpop.f32.mrf.mxu0 }
 0x1e4   : > { %v2609_v1 = vadd.f32 %v2324_v14, %v2115_v29  ;;  %v5091_v28 = vpop.f32.mrf.mxu1 }
 0x1e5   : > { %v2326_v30 = vpop.f32.mrf.mxu0 }
 0x1e6   : > { %v2481_v31 = vpop.f32.mrf.mxu1 }
 0x1e7   : > { %v2613_v35 = vadd.f32 %v2481_v31, %v2119_v38  ;;  %v2327_v0 = vpop.f32.mrf.mxu0 }
 0x1e8   : > { %v5096_v12 = vpop.f32.mrf.mxu1 }
 0x1e9   : > { %v2440_v6 = vpop.f32.mrf.mxu0 }
 0x1ea   : > { %v2611_v36 = vadd.f32 %v2440_v6, %v2117_v42  ;;  %v2484_v37 = vpop.f32.mrf.mxu1 }
 0x1eb   : > { %v2442_v13 = vpop.f32.mrf.mxu0 }
 0x1ec   : > { %v2612_v20 = vadd.f32 %v2442_v13, %v2118_v34  ;;  %v5097_v40 = vpop.f32.mrf.mxu1 }
 0x1ed   : > { %v2444_v23 = vpop.f32.mrf.mxu0 }
 0x1ee   : > { %v2599_v24 = vpop.f32.mrf.mxu1 }
 0x1ef   : > { %v2616_v43 = vadd.f32 %v2599_v24, %v2122_v63  ;;  %v2445_v46 = vpop.f32.mrf.mxu0 }
 0x1f0   : > { %v5102_v21 = vpop.f32.mrf.mxu1 }
 0x1f1   : > { %v2558_v47 = vpop.f32.mrf.mxu0 }
 0x1f2   : > { %v2614_v33 = vadd.f32 %v2558_v47, %v2120_v39  ;;  %v2602_v29 = vpop.f32.mrf.mxu1 }
 0x1f3   : > { %v2560_v49 = vpop.f32.mrf.mxu0 }
 0x1f4   : > { %v2615_v50 = vadd.f32 %v2560_v49, %v2121_v5  ;;  %v5103_v51 = vpop.f32.mrf.mxu1 }
 0x1f5   : > { %v2562_v38 = vpop.f32.mrf.mxu0 }
 0x1f6   : > { %v2739_v54 = vpop.f32.mrf.mxu1 }
 0x1f7   : > { %v6272_v25 = vadd.f32 %v2739_v54, %v2607_v11  ;;  %v2563_v32 = vpop.f32.mrf.mxu0 }
 0x1f8   : > { %v5108_v42 = vpop.f32.mrf.mxu1 }
 0x1f9   : > { %v2698_v56 = vpop.f32.mrf.mxu0 }
 0x1fa   : > { %v6274_v58 = vadd.f32 %v2698_v56, %v2605_v16  ;;  %v2742_v34 = vpop.f32.mrf.mxu1 }
 0x1fb   : > { %v2700_v59 = vpop.f32.mrf.mxu0 }
 0x1fc   : > { %v6276_v52 = vadd.f32 %v2700_v59, %v2606_v19  ;;  %v5109_v62 = vpop.f32.mrf.mxu1 }
 0x1fd   : > { %v2702_v63 = vpop.f32.mrf.mxu0 }
 0x1fe   : > { %v2857_v2 = vpop.f32.mrf.mxu1 }
 0x1ff   : > { %v6278_v57 = vadd.f32 %v2857_v2, %v2610_v22  ;;  %v2703_v4 = vpop.f32.mrf.mxu0 }
 0x200   : > { %v5114_v39 = vpop.f32.mrf.mxu1 }
 0x201   : > { %v2816_v41 = vpop.f32.mrf.mxu0 }
 0x202   : > { %v6280_v45 = vadd.f32 %v2816_v41, %v2608_v27  ;;  %v2860_v5 = vpop.f32.mrf.mxu1 }
 0x203   : > { %v2818_v8 = vpop.f32.mrf.mxu0 }
 0x204   : > { %v6282_v10 = vadd.f32 %v2818_v8, %v2609_v1  ;;  %v5115_v44 = vpop.f32.mrf.mxu1 }
 0x205   : > { %v2820_v11 = vpop.f32.mrf.mxu0 }
 0x206   : > { %v2975_v15 = vpop.f32.mrf.mxu1 }
 0x207   : > { %v6284_v48 = vadd.f32 %v2975_v15, %v2613_v35  ;;  %v2821_v53 = vpop.f32.mrf.mxu0 }
 0x208   : > { %v5120_v16 = vpop.f32.mrf.mxu1 }
 0x209   : > { %v2934_v17 = vpop.f32.mrf.mxu0 }
 0x20a   : > { %v6286_v18 = vadd.f32 %v2934_v17, %v2611_v36  ;;  %v2978_v19 = vpop.f32.mrf.mxu1 }
 0x20b   : > { %v2936_v55 = vpop.f32.mrf.mxu0 }
 0x20c   : > { %v6288_v9 = vadd.f32 %v2936_v55, %v2612_v20  ;;  %v5121_v60 = vpop.f32.mrf.mxu1 }
 0x20d   : > { %v2938_v22 = vpop.f32.mrf.mxu0 }
 0x20e   : > { %v3093_v7 = vpop.f32.mrf.mxu1 }
 0x20f   : > { %v6290_v26 = vadd.f32 %v3093_v7, %v2616_v43  ;;  %v2939_v3 = vpop.f32.mrf.mxu0 }
 0x210   : > { %v5126_v27 = vpop.f32.mrf.mxu1 }
 0x211   : > { %v3052_v61 = vpop.f32.mrf.mxu0 }
 0x212   : > { %v6292_v14 = vadd.f32 %v3052_v61, %v2614_v33  ;;  %v3096_v1 = vpop.f32.mrf.mxu1 }
 0x213   : > { %v3054_v28 = vpop.f32.mrf.mxu0 }
 0x214   : > { %v6294_v30 = vadd.f32 %v3054_v28, %v2615_v50  ;;  %v5127_v31 = vpop.f32.mrf.mxu1 }
 0x215   : > { %v3056_v35 = vpop.f32.mrf.mxu0 }
 0x216   : > { %v3233_v0 = vpop.f32.mrf.mxu1 }
 0x217   : > { %v3057_v12 = vpop.f32.mrf.mxu0 }
 0x218   : > { %v5132_v6 = vpop.f32.mrf.mxu1 }
 0x219   : > { %v6296_v36 = vpop.f32.mrf.mxu0 }
 0x21a   : > { %v3236_v37 = vpop.f32.mrf.mxu1 }
 0x21b   : > { %v6298_v13 = vpop.f32.mrf.mxu0 }
 0x21c   : > { %v5133_v20 = vpop.f32.mrf.mxu1 }
 0x21d   : > { %v3196_v40 = vpop.f32.mrf.mxu0 }
 0x21e   : > { %v6300_v23 = vpop.f32.mrf.mxu1 }
 0x21f   : > { %v3197_v24 = vpop.f32.mrf.mxu0 }
 0x220   : > { %v5138_v43 = vpop.f32.mrf.mxu1 }
 0x221   : > { %v6302_v46 = vpop.f32.mrf.mxu0 }
 0x222   : > { %v3354_v21 = vpop.f32.mrf.mxu1 }
 0x223   : > { %v6304_v47 = vpop.f32.mrf.mxu0 }
 0x224   : > { %v5139_v33 = vpop.f32.mrf.mxu1 }
 0x225   : > { %v3314_v29 = vpop.f32.mrf.mxu0 }
 0x226   : > { %v6306_v49 = vpop.f32.mrf.mxu1  ;;  %v3595_v29 = vadd.f32 %v3233_v0, %v6272_v25 }
 0x227   : > { %v3315_v50 = vpop.f32.mrf.mxu0 }
 0x228   : > { %v5144_v51 = vpop.f32.mrf.mxu1 }
 0x229   : > { %v6308_v38 = vpop.f32.mrf.mxu0 }
 0x22a   : > { %v3472_v54 = vpop.f32.mrf.mxu1 }
 0x22b   : > { %v6310_v32 = vpop.f32.mrf.mxu0 }
 0x22c   : > { %v5145_v42 = vpop.f32.mrf.mxu1 }
 0x22d   : > { %v3432_v56 = vpop.f32.mrf.mxu0 }
 0x22e   : > { %v6312_v34 = vpop.f32.mrf.mxu1  ;;  %v3593_v56 = vadd.f32 %v6296_v36, %v6274_v58 }
 0x22f   : > { %v3433_v59 = vpop.f32.mrf.mxu0 }
 0x230   : > { %v5150_v62 = vpop.f32.mrf.mxu1 }
 0x231   : > { %v6314_v63 = vpop.f32.mrf.mxu0  ;;  %v4595_v62 = vld [vmem:[#allocation2 + $0x10] sm:$0xff] }
 0x232   : > { %v3590_v2 = vpop.f32.mrf.mxu1 }
 0x233   : > { %v6316_v4 = vpop.f32.mrf.mxu0 }
 0x234   : > { %v5151_v39 = vpop.f32.mrf.mxu1 }
 0x235   : > { %v3550_v41 = vpop.f32.mrf.mxu0 }
 0x236   : > { %v3727_v5 = vpop.f32.mrf.mxu1  ;;  %v3594_v41 = vadd.f32 %v6298_v13, %v6276_v52  ;;  %v3596_v52 = vadd.f32 %v6302_v46, %v6280_v45 }
 0x237   : > { %v3551_v8 = vpop.f32.mrf.mxu0  ;;  %v4089_v54 = vadd.f32 %v3727_v5, %v3595_v29 }
 0x238   : > { %v5156_v44 = vpop.f32.mrf.mxu1 }
 0x239   : > { %v3686_v11 = vpop.f32.mrf.mxu0 }
 0x23a   : > { %v3730_v15 = vpop.f32.mrf.mxu1  ;;  %v4087_v8 = vadd.f32 %v3686_v11, %v3593_v56  ;;  %v4598_v11 = vld [vmem:[#allocation2 + $0x28] sm:$0xff] }
 0x23b   : > { %v3688_v53 = vpop.f32.mrf.mxu0 }
 0x23c   : > { %v5157_v16 = vpop.f32.mrf.mxu1  ;;  %v4088_v15 = vadd.f32 %v3688_v53, %v3594_v41 }
 0x23d   : > { %v3690_v17 = vpop.f32.mrf.mxu0 }
 0x23e   : > { %v3845_v19 = vpop.f32.mrf.mxu1  ;;  %v3598_v17 = vadd.f32 %v6300_v23, %v6278_v57  ;;  %v3597_v23 = vadd.f32 %v6304_v47, %v6282_v10 }
 0x23f   : > { %v3691_v55 = vpop.f32.mrf.mxu0 }
 0x240   : > { %v5162_v60 = vpop.f32.mrf.mxu1 }
 0x241   : > { %v3804_v22 = vpop.f32.mrf.mxu0  ;;  %v4092_v60 = vadd.f32 %v3845_v19, %v3598_v17 }
 0x242   : > { %v3848_v7 = vpop.f32.mrf.mxu1 }
 0x243   : > { %v3806_v3 = vpop.f32.mrf.mxu0 }
 0x244   : > { %v5163_v27 = vpop.f32.mrf.mxu1  ;;  %v4091_v45 = vadd.f32 %v3806_v3, %v3597_v23  ;;  %v3599_v3 = vadd.f32 %v6308_v38, %v6286_v18 }
 0x245   : > { %v3808_v61 = vpop.f32.mrf.mxu0  ;;  %v4090_v27 = vadd.f32 %v3804_v22, %v3596_v52 }
 0x246   : > { %v6318_v1 = vpop.f32.mrf.mxu1 }
 0x247   : > { %v3809_v28 = vpop.f32.mrf.mxu0 }
 0x248   : > { %v5168_v31 = vpop.f32.mrf.mxu1 }
 0x249   : > { %v6320_v35 = vpop.f32.mrf.mxu0 }
 0x24a   : > { %v3966_v12 = vpop.f32.mrf.mxu1 }
 0x24b   : > { %v6322_v6 = vpop.f32.mrf.mxu0 }
 0x24c   : > { %v5169_v37 = vpop.f32.mrf.mxu1 }
 0x24d   : > { %v3926_v20 = vpop.f32.mrf.mxu0  ;;  %v3601_v37 = vadd.f32 %v6306_v49, %v6284_v48  ;;  %v3600_v49 = vadd.f32 %v6310_v32, %v6288_v9 }
 0x24e   : > { %v6324_v40 = vpop.f32.mrf.mxu1 }
 0x24f   : > { %v3927_v24 = vpop.f32.mrf.mxu0  ;;  %v4095_v22 = vadd.f32 %v6318_v1, %v3601_v37  ;;  %v4094_v56 = vadd.f32 %v6322_v6, %v3600_v49  ;;  %v3602_v6 = vadd.f32 %v6314_v63, %v6292_v14 }
 0x250   : > { %v5174_v43 = vpop.f32.mrf.mxu1 }
 0x251   : > { %v6326_v21 = vpop.f32.mrf.mxu0 }
 0x252   : > { %v4084_v33 = vpop.f32.mrf.mxu1 }
 0x253   : > { %v6329_v50 = vpop.f32.mrf.mxu0  ;;  %v4601_v33 = vld [vmem:[#allocation2 + $0x40] sm:$0xff] }
 0x254   : > { %v5175_v51 = vpop.f32.mrf.mxu1 }
 0x255   : > { %v4044_v42 = vpop.f32.mrf.mxu0  ;;  %v4093_v51 = vadd.f32 %v6320_v35, %v3599_v3 }
 0x256   : > { %v4221_v59 = vpop.f32.mrf.mxu1 }
 0x257   : > { %v4583_v2 = vadd.f32 %v4221_v59, %v4089_v54  ;;  %v4045_v39 = vpop.f32.mrf.mxu0 }
 0x258   : > { %v5180_v25 = vpop.f32.mrf.mxu1 }
 0x259   : > { %v4607_v0 = vadd.f32 %v4595_v62, %v4583_v2  ;;  %v4180_v44 = vpop.f32.mrf.mxu0  ;;  %v3604_v62 = vadd.f32 %v6312_v34, %v6290_v26  ;;  %v3603_v34 = vadd.f32 %v6316_v4, %v6294_v30 }
 0x25a   : > { %v4581_v16 = vadd.f32 %v4180_v44, %v4087_v8  ;;  %v4224_v5 = vpop.f32.mrf.mxu1  ;;  %v4604_v8 = vld [vmem:[#allocation2 + $0x58] sm:$0xff] }
 0x25b   : > { %4620 = vst.msk [vmem:[#allocation2 + $0x10] sm:$0xff] %vm192_vm11, %v4607_v0  ;;  %v4182_v58 = vpop.f32.mrf.mxu0  ;;  %v4098_v2 = vadd.f32 %v6324_v40, %v3604_v62  ;;  %v4096_v0 = vadd.f32 %v6326_v21, %v3602_v6  ;;  %v4097_v14 = vadd.f32 %v6329_v50, %v3603_v34 }
 0x25c   : > { %v4582_v36 = vadd.f32 %v4182_v58, %v4088_v15  ;;  %v5181_v55 = vpop.f32.mrf.mxu1  ;;  %4642 = vst [vmem:[%s6343_s16] sm:$0xff] %v4581_v16 }
 0x25d   : > { %v4184_v7 = vpop.f32.mrf.mxu0 }
 0x25e   : > { %v4339_v13 = vpop.f32.mrf.mxu1  ;;  %4643 = vst [vmem:[%s6343_s16 + $0x8] sm:$0xff] %v4582_v36 }
 0x25f   : > { %v4586_v53 = vadd.f32 %v4339_v13, %v4092_v60  ;;  %v4185_v57 = vpop.f32.mrf.mxu0 }
 0x260   : > { %v5186_v19 = vpop.f32.mrf.mxu1 }
 0x261   : > { %v4610_v61 = vadd.f32 %v4598_v11, %v4586_v53  ;;  %v4298_v28 = vpop.f32.mrf.mxu0 }
 0x262   : > { %v4632_v46 = vld [vmem:[#allocation2 + $0x10] sm:$0xff]  ;;  %v4584_v31 = vadd.f32 %v4298_v28, %v4090_v27  ;;  %v4342_v12 = vpop.f32.mrf.mxu1 }
 0x263   : > { %4644 = vst.msk [vmem:[%s6343_s16 + $0x10] sm:$0xff] %vm192_vm11, %v4632_v46  ;;  %4623 = vst.msk [vmem:[#allocation2 + $0x28] sm:$0xff] %vm192_vm11, %v4610_v61  ;;  %v4300_v20 = vpop.f32.mrf.mxu0 }
 0x264   : > { %v4585_v10 = vadd.f32 %v4300_v20, %v4091_v45  ;;  %v5187_v47 = vpop.f32.mrf.mxu1  ;;  %4645 = vst [vmem:[%s6343_s16 + $0x18] sm:$0xff] %v4584_v31 }
 0x265   : > { %v4302_v24 = vpop.f32.mrf.mxu0 }
 0x266   : > { %v4457_v43 = vpop.f32.mrf.mxu1  ;;  %4646 = vst [vmem:[%s6343_s16 + $0x20] sm:$0xff] %v4585_v10 }
 0x267   : > { %v4589_v29 = vadd.f32 %v4457_v43, %v4095_v22  ;;  %v4303_v48 = vpop.f32.mrf.mxu0 }
 0x268   : > { %v5192_v54 = vpop.f32.mrf.mxu1 }
 0x269   : > { %v4613_v42 = vadd.f32 %v4601_v33, %v4589_v29  ;;  %v4416_v1 = vpop.f32.mrf.mxu0 }
 0x26a   : > { %v4635_v59 = vld [vmem:[#allocation2 + $0x28] sm:$0xff]  ;;  %v4587_v18 = vadd.f32 %v4416_v1, %v4093_v51  ;;  %v4460_v38 = vpop.f32.mrf.mxu1 }
 0x26b   : > { %4647 = vst.msk [vmem:[%s6343_s16 + $0x28] sm:$0xff] %vm192_vm11, %v4635_v59  ;;  %4626 = vst.msk [vmem:[#allocation2 + $0x40] sm:$0xff] %vm192_vm11, %v4613_v42  ;;  %v4418_v9 = vpop.f32.mrf.mxu0 }
 0x26c   : > { %v4588_v32 = vadd.f32 %v4418_v9, %v4094_v56  ;;  %v5193_v35 = vpop.f32.mrf.mxu1  ;;  %4648 = vst [vmem:[%s6343_s16 + $0x30] sm:$0xff] %v4587_v18 }
 0x26d   : > { %v4420_v39 = vpop.f32.mrf.mxu0 }
 0x26e   : > { %v4575_v41 = vpop.f32.mrf.mxu1  ;;  %4649 = vst [vmem:[%s6343_s16 + $0x38] sm:$0xff] %v4588_v32 }
 0x26f   : > { %v4592_v25 = vadd.f32 %v4575_v41, %v4098_v2  ;;  %v4421_v26 = vpop.f32.mrf.mxu0 }
 0x270   : > { %v5198_v40 = vpop.f32.mrf.mxu1 }
 0x271   : > { %v4616_v44 = vadd.f32 %v4604_v8, %v4592_v25  ;;  %v4534_v15 = vpop.f32.mrf.mxu0 }
 0x272   : > { %v4638_v63 = vld [vmem:[#allocation2 + $0x40] sm:$0xff]  ;;  %v4590_v16 = vadd.f32 %v4534_v15, %v4096_v0  ;;  %v4578_v5 = vpop.f32.mrf.mxu1 }
 0x273   : > { %4650 = vst.msk [vmem:[%s6343_s16 + $0x40] sm:$0xff] %vm192_vm11, %v4638_v63  ;;  %4629 = vst.msk [vmem:[#allocation2 + $0x58] sm:$0xff] %vm192_vm11, %v4616_v44  ;;  %v4536_v30 = vpop.f32.mrf.mxu0 }
 0x274   : > { %v4591_v4 = vadd.f32 %v4536_v30, %v4097_v14  ;;  %v5199_v21 = vpop.f32.mrf.mxu1  ;;  %4651 = vst [vmem:[%s6343_s16 + $0x48] sm:$0xff] %v4590_v16 }
 0x275   : > { %v4538_v17 = vpop.f32.mrf.mxu0 }
 0x276   : > { %4652 = vst [vmem:[%s6343_s16 + $0x50] sm:$0xff] %v4591_v4 }
 0x277   : > { %v4539_v58 = vpop.f32.mrf.mxu0 }
 0x27a   : > { %v4641_v50 = vld [vmem:[#allocation2 + $0x58] sm:$0xff] }
 0x27b   : > { %4653 = vst.msk [vmem:[%s6343_s16 + $0x58] sm:$0xff] %vm192_vm11, %v4641_v50 }
 0x27c   : > { %5321 = shalt.err (!%p5318_p5)
}
 0x27d   : > { %s5322_s3 = scalar_lea.hbm %s6387_s25, 1536  ;;  %s5326_s6 = scalar_lea.hbm %s6442_s2, 3072 }
 0x27e   : > { %p5323_p6 = scmp.ne.s32.totalorder %s6387_s25, %s5322_s3  ;;  %p5327_p10 = scmp.lt.s32.totalorder %s6387_s25, %s6442_s2 }
 0x27f   : > { %p5328_p11 = scmp.lt.s32.totalorder %s5326_s6, %s5322_s3 }
 0x280   : > { %p5324_p7 = pnand %p5323_p6, %p5456_p4 }
 0x281   : > { %p5329_p12 = por %p5328_p11, %p5327_p10 }
 0x282   : > { %p5325_p9 = pneg %p5324_p7 }
 0x284   : > { %p5330_p13 = pnand %p5329_p12, %p5325_p9 }
 0x286   : > { %5333 = shalt.err (!%p5330_p13)
}
 0x287   : > { %s5399_s27 = smov 384   ;;  %s5400_s15 = smov 24  }
 0x288   : > { %5203 = dma.vmem_to_hbm [thread:$0]  (%p5456_p4), %s6389_s20, 1536, %s6387_s25, %s6395_s12, %s5399_s27, %s5399_s27, %s5400_s15  }
 0x289 PF: > { %p5209_p0 = scmp.ge.s32.totalorder %s5384_s14, 2  ;;  %s4683_s16 = sand.u32 1, %s5364_s9  }
 0x28a   : > { %s4684_s18 = scalar_lea.sflag [#allocation4], %s4683_s16 }
 0x28b   : > { %p5206_p1 = pnand %p5209_p0, %p5463_p8 }
 0x28d   : > { %p5207_p2 = pneg %p5206_p1 }
 0x28f   : > { %5359 = dma.done.wait (%p5207_p2), %s4684_s18, 1536  }
 0x290   : > { %5361 = vsyncadd (%p5207_p2), %s4684_s18, 4294965760  ;;  %s15_s14 = sadd.s32 1, %s5384_s14   ;;  %s6445_s9 = smov %s5368_s10 }
 0x291   : > { %p12_p3 = scmp.ge.s32.totalorder %s15_s14, 4   ;;  %s6446_s10 = smov %s5372_s11 }
 0x292   : > { %s6447_s11 = smov %s5469_s22  ;;  %s6448_s12 = smov %s5380_s13 }
 0x293   : > { %s6449_s13 = smov %s6451_s17  ;;  %14 = sbr.rel (!%p12_p3) target bundleno = 4 (0x4), region = 78 }
 0x298   :  { %4689 = vsyncpa [#allocation4], 1 }
 0x299   :  { %4691 = vsyncpa [#allocation4 + $0x1], 1 }

</bundles_post_ra>
